<compile_context>
chip_gen: v6e
topology: v6e:2x2x1
jax: 0.10.0
libtpu: 0.0.40
codegen_flags: <defaults>
</compile_context>

<pallas_src>
import functools

import numpy as np
import jax
import jax.numpy as jnp
from jax.experimental import pallas as pl
from jax.experimental.pallas import tpu as pltpu


def _round_up(x, m):
    return ((x + m - 1) // m) * m


def _pad2(x, rows, cols):
    return jnp.pad(x, ((0, rows - x.shape[0]), (0, cols - x.shape[1])))


def _choose_tile(n, unit, max_tile):
    """Pick (tile, padded_total). Small problems collapse to a single tile."""
    req = _round_up(max(n, 1), unit)
    if req <= max_tile:
        return req, req
    return max_tile, _round_up(req, max_tile)


def aggregator_kernel(he_ref, node_g_ref, he_idx_ref, rel_idx_ref, sem_emb_ref,
                      w_r_ref, sem_w_ref, sem_b_ref,
                      lin_w_ref, lin_b_ref, ln_g_ref, ln_b_ref,
                      out_ref,
                      t_scr, m_scr, l_scr, acc_scr,
                      *, out_dim, mm_dtype):
    e_step = pl.program_id(1)
    tile_h = he_ref.shape[0]
    tile_e = node_g_ref.shape[0]
    r_p = sem_emb_ref.shape[0]
    d_p = w_r_ref.shape[1]

    # ---- per-H-tile init: relation table T (flat) and online-softmax state ------------
    @pl.when(e_step == 0)
    def _init():
        rel_proj = jnp.dot(sem_emb_ref[...].astype(mm_dtype),
                           sem_w_ref[...].astype(mm_dtype),
                           preferred_element_type=jnp.float32) + sem_b_ref[...]   # [r_p, d_p]
        r_mul_t = jnp.dot(he_ref[...].astype(mm_dtype), w_r_ref[...].astype(mm_dtype),
                          preferred_element_type=jnp.float32)                     # [tile_h, d_p]
        # tanh count: tile_h * r_p * d_p (independent of E); stored pre-flattened.
        t_scr[...] = jnp.tanh(
            (r_mul_t[:, None, :] + rel_proj[None, :, :]).reshape(tile_h * r_p, d_p))
        m_scr[...] = jnp.full(m_scr.shape, -1e30, dtype=m_scr.dtype)
        l_scr[...] = jnp.zeros(l_scr.shape, dtype=l_scr.dtype)
        acc_scr[...] = jnp.zeros(acc_scr.shape, dtype=acc_scr.dtype)

    # ---- score this E tile on the MXU --------------------------------------------------
    node_g = node_g_ref[...]                                                       # [tile_e, in_p]
    r_mul_h = jnp.dot(node_g.astype(mm_dtype), w_r_ref[...].astype(mm_dtype),
                      preferred_element_type=jnp.float32)                          # [tile_e, d_p]

    s_flat = jax.lax.dot_general(                                                  # T @ r_mul_h^T
        t_scr[...].astype(mm_dtype), r_mul_h.astype(mm_dtype),
        dimension_numbers=(((1,), (1,)), ((), ())),
        preferred_element_type=jnp.float32)                                        # [tile_h*r_p, tile_e]
    s = s_flat.reshape(tile_h, r_p, tile_e)

    # select each semalink's relation with a one-hot over the small r axis
    r_ids = jax.lax.broadcasted_iota(jnp.int32, (r_p, tile_e), 0)
    rel_onehot = (rel_idx_ref[...] == r_ids).astype(jnp.float32)                   # [r_p, tile_e]
    scores = jnp.sum(s * rel_onehot[None, :, :], axis=1)                           # [tile_h, tile_e]

    # membership mask + flash-style online masked softmax over E tiles
    h_ids = pl.program_id(0) * tile_h + jax.lax.broadcasted_iota(
        jnp.int32, (tile_h, tile_e), 0)
    mask = he_idx_ref[...] == h_ids                                                # [tile_h, tile_e]
    masked = jnp.where(mask, scores, jnp.float32(-1e30))

    m_prev = m_scr[...]
    m_new = jnp.maximum(m_prev, jnp.max(masked, axis=-1, keepdims=True))
    corr = jnp.exp(m_prev - m_new)
    p = jnp.where(mask, jnp.exp(masked - m_new), 0.0)
    l_scr[...] = corr * l_scr[...] + jnp.sum(p, axis=-1, keepdims=True)
    acc_scr[...] = corr * acc_scr[...] + jnp.dot(
        p.astype(mm_dtype), node_g.astype(mm_dtype),
        preferred_element_type=jnp.float32)
    m_scr[...] = m_new

    # ---- finalize: normalize, Linear -> LeakyReLU -> LayerNorm (masked to true out_dim)
    @pl.when(e_step == pl.num_programs(1) - 1)
    def _finalize():
        l_safe = jnp.maximum(l_scr[...], 1e-6)       # rows with no semalinks keep acc == 0
        inv_l = pl.reciprocal(l_safe, approx=True)   # EUP reciprocal ...
        inv_l = inv_l * (2.0 - l_safe * inv_l)       # ... + one Newton step for f32 accuracy
        agg = acc_scr[...] * inv_l                   # [tile_h, in_p]

        y = jnp.dot(agg.astype(mm_dtype), lin_w_ref[...].astype(mm_dtype),
                    preferred_element_type=jnp.float32) + lin_b_ref[...]
        y = jnp.where(y >= 0.0, y, 0.01 * y)         # LeakyReLU(0.01)

        lane = jax.lax.broadcasted_iota(jnp.int32, y.shape, 1)
        valid = lane < out_dim                       # LayerNorm only over real features
        denom = jnp.float32(out_dim)
        mu = jnp.sum(jnp.where(valid, y, 0.0), axis=-1, keepdims=True) / denom
        var = jnp.sum(jnp.where(valid, (y - mu) ** 2, 0.0), axis=-1, keepdims=True) / denom
        y = (y - mu) * jax.lax.rsqrt(var + 1e-5) * ln_g_ref[...] + ln_b_ref[...]
        out_ref[...] = y.astype(out_ref.dtype)


def semalink_attentive_aggregator(node_emb, sem_emb, he_emb, semalinks, params,
                                  *, max_tile_h=32, max_tile_e=256,
                                  matmul_dtype=jnp.bfloat16):
    """Wrapper: gather per-semalink node rows (glue), pad to TPU-friendly shapes,
    then run one gridded Pallas kernel. Returns [H, out_dim] float32."""
    H, in_dim = he_emb.shape
    n_rel, sem_in_dim = sem_emb.shape
    out_dim = params["W_r"].shape[1]
    E = semalinks.shape[0]

    in_p = _round_up(in_dim, 128)
    d_p = _round_up(out_dim, 128)
    sem_in_p = _round_up(sem_in_dim, 128)
    r_p = _round_up(n_rel, 8)
    tile_h, h_p = _choose_tile(H, 8, max_tile_h)      # H tile: multiple of 8 sublanes
    tile_e, e_p = _choose_tile(E, 128, max_tile_e)    # E tile: multiple of 128 lanes

    node_idx = semalinks[:, 0]
    he_idx = semalinks[:, 1].astype(jnp.int32)
    rel_idx = semalinks[:, 2].astype(jnp.int32)

    # TODO(synk): for very large E replace this XLA gather with an in-kernel row gather
    # (pl.Element BlockSpec / manual DMA driven by scalar-prefetched node_idx).
    node_g = jnp.take(node_emb, node_idx, axis=0)                    # [E, in_dim]

    mm = matmul_dtype
    he_p = _pad2(he_emb, h_p, in_p).astype(mm)
    node_g_p = _pad2(node_g, e_p, in_p).astype(mm)
    sem_emb_p = _pad2(sem_emb, r_p, sem_in_p).astype(mm)
    w_r_p = _pad2(params["W_r"], in_p, d_p).astype(mm)
    sem_w_p = _pad2(params["sem_w_t"], sem_in_p, d_p).astype(mm)
    lin_w_p = _pad2(params["lin_w_t"], in_p, d_p).astype(mm)
    sem_b_p = _pad2(params["sem_b"], 1, d_p).astype(jnp.float32)
    lin_b_p = _pad2(params["lin_b"], 1, d_p).astype(jnp.float32)
    ln_g_p = _pad2(params["ln_g"], 1, d_p).astype(jnp.float32)
    ln_b_p = _pad2(params["ln_b"], 1, d_p).astype(jnp.float32)
    he_idx_p = jnp.pad(he_idx, (0, e_p - E), constant_values=-1).reshape(1, e_p)
    rel_idx_p = jnp.pad(rel_idx, (0, e_p - E), constant_values=-1).reshape(1, e_p)

    grid = (h_p // tile_h, e_p // tile_e)

    def resident(shape):   # constant block index -> stays in VMEM across grid steps
        return pl.BlockSpec(shape, lambda h, e: (0, 0))

    kernel = functools.partial(aggregator_kernel, out_dim=out_dim, mm_dtype=mm)

    out = pl.pallas_call(
        kernel,
        out_shape=jax.ShapeDtypeStruct((h_p, d_p), jnp.float32),
        grid_spec=pltpu.PrefetchScalarGridSpec(
            num_scalar_prefetch=0,
            grid=grid,
            in_specs=[
                pl.BlockSpec((tile_h, in_p), lambda h, e: (h, 0)),   # hyperedge embeddings
                pl.BlockSpec((tile_e, in_p), lambda h, e: (e, 0)),   # gathered node embeddings
                pl.BlockSpec((1, tile_e), lambda h, e: (0, e)),      # hyperedge index per semalink
                pl.BlockSpec((1, tile_e), lambda h, e: (0, e)),      # relation index per semalink
                resident((r_p, sem_in_p)),                           # raw relation embeddings
                resident((in_p, d_p)),                               # W_r
                resident((sem_in_p, d_p)),                           # semalink_linear W
                resident((1, d_p)),                                  # semalink_linear b
                resident((in_p, d_p)),                               # final linear W
                resident((1, d_p)),                                  # final linear b
                resident((1, d_p)),                                  # LayerNorm gamma
                resident((1, d_p)),                                  # LayerNorm beta
            ],
            out_specs=pl.BlockSpec((tile_h, d_p), lambda h, e: (h, 0)),
            scratch_shapes=[
                pltpu.VMEM((tile_h * r_p, d_p), jnp.float32),        # tanh relation table (flat)
                pltpu.VMEM((tile_h, 1), jnp.float32),                # running max m
                pltpu.VMEM((tile_h, 1), jnp.float32),                # running denom l
                pltpu.VMEM((tile_h, in_p), jnp.float32),             # running weighted sum
            ]),
        compiler_params=pltpu.CompilerParams(
            dimension_semantics=("parallel", "arbitrary"),
            vmem_limit_bytes=32 * 1024 * 1024),
    )(he_p, node_g_p, he_idx_p, rel_idx_p, sem_emb_p,
      w_r_p, sem_w_p, sem_b_p, lin_w_p, lin_b_p, ln_g_p, ln_b_p)

    return out[:H, :out_dim]


def _xavier_uniform(key, shape):
    fan_in, fan_out = shape[0], shape[1]
    limit = float(np.sqrt(6.0 / (fan_in + fan_out)))
    return jax.random.uniform(key, shape, jnp.float32, -limit, limit)


def reference_numpy(node_e, sem_e, he_e, semalinks, params):
    """Loop-level numpy reference reproducing the PyTorch module semantics."""
    W_r = np.asarray(params["W_r"])
    sem_w_t = np.asarray(params["sem_w_t"]); sem_b = np.asarray(params["sem_b"])[0]
    lin_w_t = np.asarray(params["lin_w_t"]); lin_b = np.asarray(params["lin_b"])[0]
    ln_g = np.asarray(params["ln_g"])[0]; ln_b = np.asarray(params["ln_b"])[0]

    rel_t = sem_e @ sem_w_t + sem_b
    H, in_dim = he_e.shape
    agg = []
    for i in range(H):
        r_mul_t = he_e[i] @ W_r
        scores, nodes = [], []
        for (n, h, r) in semalinks:
            if h == i:
                r_mul_h = node_e[n] @ W_r
                scores.append(float(r_mul_h @ np.tanh(r_mul_t + rel_t[r])))
                nodes.append(node_e[n])
        if scores:
            sc = np.array(scores, dtype=np.float64)
            a = np.exp(sc - sc.max()); a /= a.sum()
            agg.append((a[:, None] * np.stack(nodes)).sum(0))
        else:
            agg.append(np.zeros(in_dim))
    agg = np.stack(agg).astype(np.float64)
    y = agg @ lin_w_t + lin_b
    y = np.where(y >= 0, y, 0.01 * y)
    mu = y.mean(-1, keepdims=True)
    var = ((y - mu) ** 2).mean(-1, keepdims=True)
    y = (y - mu) / np.sqrt(var + 1e-5) * ln_g + ln_b
    return y


if __name__ == "__main__":
    # small shapes consistent with the module (non-128-multiples exercise the padding path)
    N_nodes, H, N_rel = 30, 11, 6
    in_dim, out_dim, semalink_in_dim = 48, 40, 24
    E = 275

    key = jax.random.PRNGKey(0)
    ks = jax.random.split(key, 10)

    node_emb = jax.random.normal(ks[0], (N_nodes, in_dim), jnp.float32)
    sem_emb = jax.random.normal(ks[1], (N_rel, semalink_in_dim), jnp.float32)
    he_emb = jax.random.normal(ks[2], (H, in_dim), jnp.float32)

    # semalinks: (node_idx, hyperedge_idx, relation_idx); hyperedge H-1 gets none
    node_idx = jax.random.randint(ks[3], (E,), 0, N_nodes)
    he_idx = jax.random.randint(ks[4], (E,), 0, H - 1)
    rel_idx = jax.random.randint(ks[5], (E,), 0, N_rel)
    semalinks = jnp.stack([node_idx, he_idx, rel_idx], axis=1).astype(jnp.int32)

    params = {
        # nn.Linear(in_dim, out_dim): weight [out,in] xavier -> stored transposed [in,out]
        "lin_w_t": _xavier_uniform(ks[6], (out_dim, in_dim)).T,
        "lin_b": jnp.zeros((1, out_dim), jnp.float32),
        # W_r: Parameter(in_dim, out_dim), xavier
        "W_r": _xavier_uniform(ks[7], (in_dim, out_dim)),
        # semalink_linear(semalink_in_dim, out_dim)
        "sem_w_t": _xavier_uniform(ks[8], (out_dim, semalink_in_dim)).T,
        "sem_b": 0.01 * jax.random.normal(ks[9], (1, out_dim), jnp.float32),
        # LayerNorm(out_dim) defaults
        "ln_g": jnp.ones((1, out_dim), jnp.float32),
        "ln_b": jnp.zeros((1, out_dim), jnp.float32),
    }

    ref = reference_numpy(np.asarray(node_emb), np.asarray(sem_emb),
                          np.asarray(he_emb), np.asarray(semalinks), params)

    # f32 MXU operands + small tiles -> exercises the multi-H-tile / multi-E-tile grid path;
    # tight algorithmic check against the float64 loop reference.
    out_f32 = semalink_attentive_aggregator(node_emb, sem_emb, he_emb, semalinks,
                                            params, matmul_dtype=jnp.float32,
                                            max_tile_h=8, max_tile_e=128)
    out_f32 = jax.block_until_ready(out_f32)
    np.testing.assert_allclose(np.asarray(out_f32), ref, rtol=1e-3, atol=1e-3)

    # bf16 MXU operands, default (large) tiles (production mode): loose sanity check
    out_bf16 = semalink_attentive_aggregator(node_emb, sem_emb, he_emb, semalinks,
                                             params, matmul_dtype=jnp.bfloat16)
    out_bf16 = jax.block_until_ready(out_bf16)
    out_bf16 = np.asarray(out_bf16)
    assert np.all(np.isfinite(out_bf16))
    assert np.max(np.abs(out_bf16 - ref)) < 0.5

    print("KERNEL_OK")
</pallas_src>

<mosaic_0001>
module attributes {stable_mosaic.version = 11 : i64} {
  func.func @aggregator_kernel(%arg0: i32, %arg1: i32, %arg2: memref<8x128xf32, #tpu.memory_space<vmem>>, %arg3: memref<128x128xf32, #tpu.memory_space<vmem>>, %arg4: memref<1x128xi32, #tpu.memory_space<vmem>>, %arg5: memref<1x128xi32, #tpu.memory_space<vmem>>, %arg6: memref<8x128xf32, #tpu.memory_space<vmem>>, %arg7: memref<128x128xf32, #tpu.memory_space<vmem>>, %arg8: memref<128x128xf32, #tpu.memory_space<vmem>>, %arg9: memref<1x128xf32, #tpu.memory_space<vmem>>, %arg10: memref<128x128xf32, #tpu.memory_space<vmem>>, %arg11: memref<1x128xf32, #tpu.memory_space<vmem>>, %arg12: memref<1x128xf32, #tpu.memory_space<vmem>>, %arg13: memref<1x128xf32, #tpu.memory_space<vmem>>, %arg14: memref<8x128xf32, #tpu.memory_space<vmem>>, %arg15: memref<64x128xf32, #tpu.memory_space<vmem>>, %arg16: memref<8x1xf32, #tpu.memory_space<vmem>>, %arg17: memref<8x1xf32, #tpu.memory_space<vmem>>, %arg18: memref<8x128xf32, #tpu.memory_space<vmem>>) attributes {dimension_semantics = [#tpu.dimension_semantics<parallel>, #tpu.dimension_semantics<arbitrary>], iteration_bounds = array<i64: 2, 3>, scalar_prefetch = 0 : i64, scratch_operands = 4 : i64, tpu.core_type = #tpu.core_type<tc>, window_params = [{transform_indices = @transform_0, window_bounds = array<i64: 8, 128>}, {transform_indices = @transform_1, window_bounds = array<i64: 128, 128>}, {transform_indices = @transform_2, window_bounds = array<i64: 1, 128>}, {transform_indices = @transform_3, window_bounds = array<i64: 1, 128>}, {pipeline_mode = #tpu.pipeline_mode<synchronous>, transform_indices = @transform_4, window_bounds = array<i64: 8, 128>}, {pipeline_mode = #tpu.pipeline_mode<synchronous>, transform_indices = @transform_5, window_bounds = array<i64: 128, 128>}, {pipeline_mode = #tpu.pipeline_mode<synchronous>, transform_indices = @transform_6, window_bounds = array<i64: 128, 128>}, {pipeline_mode = #tpu.pipeline_mode<synchronous>, transform_indices = @transform_7, window_bounds = array<i64: 1, 128>}, {pipeline_mode = #tpu.pipeline_mode<synchronous>, transform_indices = @transform_8, window_bounds = array<i64: 128, 128>}, {pipeline_mode = #tpu.pipeline_mode<synchronous>, transform_indices = @transform_9, window_bounds = array<i64: 1, 128>}, {pipeline_mode = #tpu.pipeline_mode<synchronous>, transform_indices = @transform_10, window_bounds = array<i64: 1, 128>}, {pipeline_mode = #tpu.pipeline_mode<synchronous>, transform_indices = @transform_11, window_bounds = array<i64: 1, 128>}, {transform_indices = @transform_12, window_bounds = array<i64: 8, 128>}]} {
    %c0_i32 = arith.constant 0 : i32
    %0 = arith.cmpi eq, %arg1, %c0_i32 : i32
    %1 = arith.extui %0 : i1 to i32
    %c0_i32_0 = arith.constant 0 : i32
    %2 = arith.cmpi ne, %1, %c0_i32_0 : i32
    scf.if %2 {
      %c0_30 = arith.constant 0 : index
      %c0_31 = arith.constant 0 : index
      %55 = vector.load %arg6[%c0_30, %c0_31] : memref<8x128xf32, #tpu.memory_space<vmem>>, vector<8x128xf32>
      %c0_32 = arith.constant 0 : index
      %c0_33 = arith.constant 0 : index
      %56 = vector.load %arg8[%c0_32, %c0_33] : memref<128x128xf32, #tpu.memory_space<vmem>>, vector<128x128xf32>
      %cst_34 = arith.constant dense<0.000000e+00> : vector<8x128xf32>
      %57 = tpu.matmul %55, %56, %cst_34 {dimension_numbers = #tpu.dot_dimension_numbers<[1], [0], [0], [1], [0, 0, 1, 1], [], []>} : vector<8x128xf32>, vector<128x128xf32>, vector<8x128xf32> -> vector<8x128xf32>
      %c0_35 = arith.constant 0 : index
      %c0_36 = arith.constant 0 : index
      %58 = vector.load %arg9[%c0_35, %c0_36] : memref<1x128xf32, #tpu.memory_space<vmem>>, vector<1x128xf32>
      %59 = vector.broadcast %58 : vector<1x128xf32> to vector<8x128xf32>
      %60 = arith.addf %57, %59 : vector<8x128xf32>
      %c0_37 = arith.constant 0 : index
      %c0_38 = arith.constant 0 : index
      %61 = vector.load %arg2[%c0_37, %c0_38] : memref<8x128xf32, #tpu.memory_space<vmem>>, vector<8x128xf32>
      %c0_39 = arith.constant 0 : index
      %c0_40 = arith.constant 0 : index
      %62 = vector.load %arg7[%c0_39, %c0_40] : memref<128x128xf32, #tpu.memory_space<vmem>>, vector<128x128xf32>
      %cst_41 = arith.constant dense<0.000000e+00> : vector<8x128xf32>
      %63 = tpu.matmul %61, %62, %cst_41 {dimension_numbers = #tpu.dot_dimension_numbers<[1], [0], [0], [1], [0, 0, 1, 1], [], []>} : vector<8x128xf32>, vector<128x128xf32>, vector<8x128xf32> -> vector<8x128xf32>
      %64 = vector.shape_cast %63 : vector<8x128xf32> to vector<8x1x128xf32>
      %65 = vector.shape_cast %60 : vector<8x128xf32> to vector<1x8x128xf32>
      %66 = vector.broadcast %64 : vector<8x1x128xf32> to vector<8x8x128xf32>
      %67 = vector.broadcast %65 : vector<1x8x128xf32> to vector<8x8x128xf32>
      %68 = arith.addf %66, %67 : vector<8x8x128xf32>
      %69 = vector.shape_cast %68 : vector<8x8x128xf32> to vector<64x128xf32>
      %70 = math.tanh %69 : vector<64x128xf32>
      %c0_42 = arith.constant 0 : index
      %c0_43 = arith.constant 0 : index
      %71 = vector.load %arg15[%c0_42, %c0_43] : memref<64x128xf32, #tpu.memory_space<vmem>>, vector<64x128xf32>
      tpu.vector_store %arg15[%c0_42, %c0_43], %70 {strides = array<i32>} : memref<64x128xf32, #tpu.memory_space<vmem>>, vector<64x128xf32>,
      %cst_44 = arith.constant -1.000000e+30 : f32
      %72 = vector.broadcast %cst_44 : f32 to vector<8x1xf32>
      %c0_45 = arith.constant 0 : index
      %c0_46 = arith.constant 0 : index
      %73 = vector.load %arg16[%c0_45, %c0_46] : memref<8x1xf32, #tpu.memory_space<vmem>>, vector<8x1xf32>
      tpu.vector_store %arg16[%c0_45, %c0_46], %72 {strides = array<i32>} : memref<8x1xf32, #tpu.memory_space<vmem>>, vector<8x1xf32>,
      %cst_47 = arith.constant 0.000000e+00 : f32
      %74 = vector.broadcast %cst_47 : f32 to vector<8x1xf32>
      %c0_48 = arith.constant 0 : index
      %c0_49 = arith.constant 0 : index
      %75 = vector.load %arg17[%c0_48, %c0_49] : memref<8x1xf32, #tpu.memory_space<vmem>>, vector<8x1xf32>
      tpu.vector_store %arg17[%c0_48, %c0_49], %74 {strides = array<i32>} : memref<8x1xf32, #tpu.memory_space<vmem>>, vector<8x1xf32>,
      %cst_50 = arith.constant 0.000000e+00 : f32
      %76 = vector.broadcast %cst_50 : f32 to vector<8x128xf32>
      %c0_51 = arith.constant 0 : index
      %c0_52 = arith.constant 0 : index
      %77 = vector.load %arg18[%c0_51, %c0_52] : memref<8x128xf32, #tpu.memory_space<vmem>>, vector<8x128xf32>
      tpu.vector_store %arg18[%c0_51, %c0_52], %76 {strides = array<i32>} : memref<8x128xf32, #tpu.memory_space<vmem>>, vector<8x128xf32>,
    } else {
    }
    %c0 = arith.constant 0 : index
    %c0_1 = arith.constant 0 : index
    %3 = vector.load %arg3[%c0, %c0_1] : memref<128x128xf32, #tpu.memory_space<vmem>>, vector<128x128xf32>
    %c0_2 = arith.constant 0 : index
    %c0_3 = arith.constant 0 : index
    %4 = vector.load %arg7[%c0_2, %c0_3] : memref<128x128xf32, #tpu.memory_space<vmem>>, vector<128x128xf32>
    %cst = arith.constant dense<0.000000e+00> : vector<128x128xf32>
    %5 = tpu.matmul %3, %4, %cst {dimension_numbers = #tpu.dot_dimension_numbers<[1], [0], [0], [1], [0, 0, 1, 1], [], []>} : vector<128x128xf32>, vector<128x128xf32>, vector<128x128xf32> -> vector<128x128xf32>
    %c0_4 = arith.constant 0 : index
    %c0_5 = arith.constant 0 : index
    %6 = vector.load %arg15[%c0_4, %c0_5] : memref<64x128xf32, #tpu.memory_space<vmem>>, vector<64x128xf32>
    %cst_6 = arith.constant dense<0.000000e+00> : vector<64x128xf32>
    %7 = tpu.matmul %6, %5, %cst_6 {dimension_numbers = #tpu.dot_dimension_numbers<[1], [1], [0], [0], [0, 0, 1, 0], [], []>} : vector<64x128xf32>, vector<128x128xf32>, vector<64x128xf32> -> vector<64x128xf32>
    %8 = vector.shape_cast %7 : vector<64x128xf32> to vector<8x8x128xf32>
    %9 = tpu.iota {dimensions = array<i32: 0>} : vector<8x128xi32>
    %c0_7 = arith.constant 0 : index
    %c0_8 = arith.constant 0 : index
    %10 = vector.load %arg5[%c0_7, %c0_8] : memref<1x128xi32, #tpu.memory_space<vmem>>, vector<1x128xi32>
    %11 = vector.broadcast %10 : vector<1x128xi32> to vector<8x128xi32>
    %12 = arith.cmpi eq, %11, %9 : vector<8x128xi32>
    %13 = arith.extui %12 : vector<8x128xi1> to vector<8x128xi32>
    %14 = arith.sitofp %13 : vector<8x128xi32> to vector<8x128xf32>
    %15 = vector.shape_cast %14 : vector<8x128xf32> to vector<1x8x128xf32>
    %16 = vector.broadcast %15 : vector<1x8x128xf32> to vector<8x8x128xf32>
    %17 = arith.mulf %8, %16 : vector<8x8x128xf32>
    %cst_9 = arith.constant dense<0.000000e+00> : vector<8x128xf32>
    %18 = vector.multi_reduction <add>, %17, %cst_9 [1] : vector<8x8x128xf32> to vector<8x128xf32>
    %c8_i32 = arith.constant 8 : i32
    %19 = arith.muli %arg0, %c8_i32 : i32
    %20 = tpu.iota {dimensions = array<i32: 0>} : vector<8x128xi32>
    %21 = vector.broadcast %19 : i32 to vector<8x128xi32>
    %22 = arith.addi %21, %20 : vector<8x128xi32>
    %c0_10 = arith.constant 0 : index
    %c0_11 = arith.constant 0 : index
    %23 = vector.load %arg4[%c0_10, %c0_11] : memref<1x128xi32, #tpu.memory_space<vmem>>, vector<1x128xi32>
    %24 = vector.broadcast %23 : vector<1x128xi32> to vector<8x128xi32>
    %25 = arith.cmpi eq, %24, %22 : vector<8x128xi32>
    %cst_12 = arith.constant -1.000000e+30 : f32
    %26 = vector.broadcast %cst_12 : f32 to vector<8x128xf32>
    %27 = arith.select %25, %18, %26 : vector<8x128xi1>, vector<8x128xf32>
    %c0_13 = arith.constant 0 : index
    %c0_14 = arith.constant 0 : index
    %28 = vector.load %arg16[%c0_13, %c0_14] : memref<8x1xf32, #tpu.memory_space<vmem>>, vector<8x1xf32>
    %cst_15 = arith.constant dense<0xFF800000> : vector<8xf32>
    %29 = vector.multi_reduction <maximumf>, %27, %cst_15 [1] : vector<8x128xf32> to vector<8xf32>
    %30 = vector.shape_cast %29 : vector<8xf32> to vector<8x1xf32>
    %31 = arith.maximumf %28, %30 : vector<8x1xf32>
    %32 = arith.subf %28, %31 : vector<8x1xf32>
    %33 = math.exp %32 : vector<8x1xf32>
    %34 = vector.broadcast %31 : vector<8x1xf32> to vector<8x128xf32>
    %35 = arith.subf %27, %34 : vector<8x128xf32>
    %36 = math.exp %35 : vector<8x128xf32>
    %cst_16 = arith.constant 0.000000e+00 : f32
    %37 = vector.broadcast %cst_16 : f32 to vector<8x128xf32>
    %38 = arith.select %25, %36, %37 : vector<8x128xi1>, vector<8x128xf32>
    %c0_17 = arith.constant 0 : index
    %c0_18 = arith.constant 0 : index
    %39 = vector.load %arg17[%c0_17, %c0_18] : memref<8x1xf32, #tpu.memory_space<vmem>>, vector<8x1xf32>
    %40 = arith.mulf %33, %39 : vector<8x1xf32>
    %cst_19 = arith.constant dense<0.000000e+00> : vector<8xf32>
    %41 = vector.multi_reduction <add>, %38, %cst_19 [1] : vector<8x128xf32> to vector<8xf32>
    %42 = vector.shape_cast %41 : vector<8xf32> to vector<8x1xf32>
    %43 = arith.addf %40, %42 : vector<8x1xf32>
    %c0_20 = arith.constant 0 : index
    %c0_21 = arith.constant 0 : index
    %44 = vector.load %arg17[%c0_20, %c0_21] : memref<8x1xf32, #tpu.memory_space<vmem>>, vector<8x1xf32>
    tpu.vector_store %arg17[%c0_20, %c0_21], %43 {strides = array<i32>} : memref<8x1xf32, #tpu.memory_space<vmem>>, vector<8x1xf32>,
    %c0_22 = arith.constant 0 : index
    %c0_23 = arith.constant 0 : index
    %45 = vector.load %arg18[%c0_22, %c0_23] : memref<8x128xf32, #tpu.memory_space<vmem>>, vector<8x128xf32>
    %46 = vector.broadcast %33 : vector<8x1xf32> to vector<8x128xf32>
    %47 = arith.mulf %46, %45 : vector<8x128xf32>
    %cst_24 = arith.constant dense<0.000000e+00> : vector<8x128xf32>
    %48 = tpu.matmul %38, %3, %cst_24 {dimension_numbers = #tpu.dot_dimension_numbers<[1], [0], [0], [1], [0, 0, 1, 1], [], []>} : vector<8x128xf32>, vector<128x128xf32>, vector<8x128xf32> -> vector<8x128xf32>
    %49 = arith.addf %47, %48 : vector<8x128xf32>
    %c0_25 = arith.constant 0 : index
    %c0_26 = arith.constant 0 : index
    %50 = vector.load %arg18[%c0_25, %c0_26] : memref<8x128xf32, #tpu.memory_space<vmem>>, vector<8x128xf32>
    tpu.vector_store %arg18[%c0_25, %c0_26], %49 {strides = array<i32>} : memref<8x128xf32, #tpu.memory_space<vmem>>, vector<8x128xf32>,
    %c0_27 = arith.constant 0 : index
    %c0_28 = arith.constant 0 : index
    %51 = vector.load %arg16[%c0_27, %c0_28] : memref<8x1xf32, #tpu.memory_space<vmem>>, vector<8x1xf32>
    tpu.vector_store %arg16[%c0_27, %c0_28], %31 {strides = array<i32>} : memref<8x1xf32, #tpu.memory_space<vmem>>, vector<8x1xf32>,
    %c2_i32 = arith.constant 2 : i32
    %52 = arith.cmpi eq, %arg1, %c2_i32 : i32
    %53 = arith.extui %52 : i1 to i32
    %c0_i32_29 = arith.constant 0 : i32
    %54 = arith.cmpi ne, %53, %c0_i32_29 : i32
    scf.if %54 {
      %c0_30 = arith.constant 0 : index
      %c0_31 = arith.constant 0 : index
      %55 = vector.load %arg17[%c0_30, %c0_31] : memref<8x1xf32, #tpu.memory_space<vmem>>, vector<8x1xf32>
      %cst_32 = arith.constant 9.99999997E-7 : f32
      %56 = vector.broadcast %cst_32 : f32 to vector<8x1xf32>
      %57 = arith.maximumf %55, %56 : vector<8x1xf32>
      %58 = tpu.reciprocal %57 {approx = true} : vector<8x1xf32> -> vector<8x1xf32>
      %59 = arith.mulf %57, %58 : vector<8x1xf32>
      %cst_33 = arith.constant 2.000000e+00 : f32
      %60 = vector.broadcast %cst_33 : f32 to vector<8x1xf32>
      %61 = arith.subf %60, %59 : vector<8x1xf32>
      %62 = arith.mulf %58, %61 : vector<8x1xf32>
      %c0_34 = arith.constant 0 : index
      %c0_35 = arith.constant 0 : index
      %63 = vector.load %arg18[%c0_34, %c0_35] : memref<8x128xf32, #tpu.memory_space<vmem>>, vector<8x128xf32>
      %64 = vector.broadcast %62 : vector<8x1xf32> to vector<8x128xf32>
      %65 = arith.mulf %63, %64 : vector<8x128xf32>
      %c0_36 = arith.constant 0 : index
      %c0_37 = arith.constant 0 : index
      %66 = vector.load %arg10[%c0_36, %c0_37] : memref<128x128xf32, #tpu.memory_space<vmem>>, vector<128x128xf32>
      %cst_38 = arith.constant dense<0.000000e+00> : vector<8x128xf32>
      %67 = tpu.matmul %65, %66, %cst_38 {dimension_numbers = #tpu.dot_dimension_numbers<[1], [0], [0], [1], [0, 0, 1, 1], [], []>} : vector<8x128xf32>, vector<128x128xf32>, vector<8x128xf32> -> vector<8x128xf32>
      %c0_39 = arith.constant 0 : index
      %c0_40 = arith.constant 0 : index
      %68 = vector.load %arg11[%c0_39, %c0_40] : memref<1x128xf32, #tpu.memory_space<vmem>>, vector<1x128xf32>
      %69 = vector.broadcast %68 : vector<1x128xf32> to vector<8x128xf32>
      %70 = arith.addf %67, %69 : vector<8x128xf32>
      %cst_41 = arith.constant 0.000000e+00 : f32
      %71 = vector.broadcast %cst_41 : f32 to vector<8x128xf32>
      %72 = arith.cmpf oge, %70, %71 : vector<8x128xf32>
      %cst_42 = arith.constant 0.00999999977 : f32
      %73 = vector.broadcast %cst_42 : f32 to vector<8x128xf32>
      %74 = arith.mulf %73, %70 : vector<8x128xf32>
      %75 = arith.select %72, %70, %74 : vector<8x128xi1>, vector<8x128xf32>
      %76 = tpu.iota {dimensions = array<i32: 1>} : vector<8x128xi32>
      %c40_i32 = arith.constant 40 : i32
      %77 = vector.broadcast %c40_i32 : i32 to vector<8x128xi32>
      %78 = arith.cmpi slt, %76, %77 : vector<8x128xi32>
      %cst_43 = arith.constant 0.000000e+00 : f32
      %79 = vector.broadcast %cst_43 : f32 to vector<8x128xf32>
      %80 = arith.select %78, %75, %79 : vector<8x128xi1>, vector<8x128xf32>
      %cst_44 = arith.constant dense<0.000000e+00> : vector<8xf32>
      %81 = vector.multi_reduction <add>, %80, %cst_44 [1] : vector<8x128xf32> to vector<8xf32>
      %82 = vector.shape_cast %81 : vector<8xf32> to vector<8x1xf32>
      %cst_45 = arith.constant 4.000000e+01 : f32
      %83 = vector.broadcast %cst_45 : f32 to vector<8x1xf32>
      %84 = arith.divf %82, %83 : vector<8x1xf32>
      %85 = vector.broadcast %84 : vector<8x1xf32> to vector<8x128xf32>
      %86 = arith.subf %75, %85 : vector<8x128xf32>
      %87 = arith.mulf %86, %86 : vector<8x128xf32>
      %cst_46 = arith.constant 0.000000e+00 : f32
      %88 = vector.broadcast %cst_46 : f32 to vector<8x128xf32>
      %89 = arith.select %78, %87, %88 : vector<8x128xi1>, vector<8x128xf32>
      %cst_47 = arith.constant dense<0.000000e+00> : vector<8xf32>
      %90 = vector.multi_reduction <add>, %89, %cst_47 [1] : vector<8x128xf32> to vector<8xf32>
      %91 = vector.shape_cast %90 : vector<8xf32> to vector<8x1xf32>
      %cst_48 = arith.constant 4.000000e+01 : f32
      %92 = vector.broadcast %cst_48 : f32 to vector<8x1xf32>
      %93 = arith.divf %91, %92 : vector<8x1xf32>
      %94 = vector.broadcast %84 : vector<8x1xf32> to vector<8x128xf32>
      %95 = arith.subf %75, %94 : vector<8x128xf32>
      %cst_49 = arith.constant 9.99999974E-6 : f32
      %96 = vector.broadcast %cst_49 : f32 to vector<8x1xf32>
      %97 = arith.addf %93, %96 : vector<8x1xf32>
      %98 = math.rsqrt %97 : vector<8x1xf32>
      %99 = vector.broadcast %98 : vector<8x1xf32> to vector<8x128xf32>
      %100 = arith.mulf %95, %99 : vector<8x128xf32>
      %c0_50 = arith.constant 0 : index
      %c0_51 = arith.constant 0 : index
      %101 = vector.load %arg12[%c0_50, %c0_51] : memref<1x128xf32, #tpu.memory_space<vmem>>, vector<1x128xf32>
      %102 = vector.broadcast %101 : vector<1x128xf32> to vector<8x128xf32>
      %103 = arith.mulf %100, %102 : vector<8x128xf32>
      %c0_52 = arith.constant 0 : index
      %c0_53 = arith.constant 0 : index
      %104 = vector.load %arg13[%c0_52, %c0_53] : memref<1x128xf32, #tpu.memory_space<vmem>>, vector<1x128xf32>
      %105 = vector.broadcast %104 : vector<1x128xf32> to vector<8x128xf32>
      %106 = arith.addf %103, %105 : vector<8x128xf32>
      %c0_54 = arith.constant 0 : index
      %c0_55 = arith.constant 0 : index
      %107 = vector.load %arg14[%c0_54, %c0_55] : memref<8x128xf32, #tpu.memory_space<vmem>>, vector<8x128xf32>
      tpu.vector_store %arg14[%c0_54, %c0_55], %106 {strides = array<i32>} : memref<8x128xf32, #tpu.memory_space<vmem>>, vector<8x128xf32>,
    } else {
    }
    return
  }
  func.func @transform_0(%arg0: i32, %arg1: i32) -> (i32, i32) {
    %c0_i32 = arith.constant 0 : i32
    %c0_i32_0 = arith.constant 0 : i32
    return %arg0, %c0_i32 : i32, i32
  }
  func.func @transform_1(%arg0: i32, %arg1: i32) -> (i32, i32) {
    %c0_i32 = arith.constant 0 : i32
    %c0_i32_0 = arith.constant 0 : i32
    return %arg1, %c0_i32 : i32, i32
  }
  func.func @transform_2(%arg0: i32, %arg1: i32) -> (i32, i32) {
    %c0_i32 = arith.constant 0 : i32
    %c0_i32_0 = arith.constant 0 : i32
    return %c0_i32, %arg1 : i32, i32
  }
  func.func @transform_3(%arg0: i32, %arg1: i32) -> (i32, i32) {
    %c0_i32 = arith.constant 0 : i32
    %c0_i32_0 = arith.constant 0 : i32
    return %c0_i32, %arg1 : i32, i32
  }
  func.func @transform_4(%arg0: i32, %arg1: i32) -> (i32, i32) {
    %c0_i32 = arith.constant 0 : i32
    %c0_i32_0 = arith.constant 0 : i32
    %c0_i32_1 = arith.constant 0 : i32
    return %c0_i32, %c0_i32_0 : i32, i32
  }
  func.func @transform_5(%arg0: i32, %arg1: i32) -> (i32, i32) {
    %c0_i32 = arith.constant 0 : i32
    %c0_i32_0 = arith.constant 0 : i32
    %c0_i32_1 = arith.constant 0 : i32
    return %c0_i32, %c0_i32_0 : i32, i32
  }
  func.func @transform_6(%arg0: i32, %arg1: i32) -> (i32, i32) {
    %c0_i32 = arith.constant 0 : i32
    %c0_i32_0 = arith.constant 0 : i32
    %c0_i32_1 = arith.constant 0 : i32
    return %c0_i32, %c0_i32_0 : i32, i32
  }
  func.func @transform_7(%arg0: i32, %arg1: i32) -> (i32, i32) {
    %c0_i32 = arith.constant 0 : i32
    %c0_i32_0 = arith.constant 0 : i32
    %c0_i32_1 = arith.constant 0 : i32
    return %c0_i32, %c0_i32_0 : i32, i32
  }
  func.func @transform_8(%arg0: i32, %arg1: i32) -> (i32, i32) {
    %c0_i32 = arith.constant 0 : i32
    %c0_i32_0 = arith.constant 0 : i32
    %c0_i32_1 = arith.constant 0 : i32
    return %c0_i32, %c0_i32_0 : i32, i32
  }
  func.func @transform_9(%arg0: i32, %arg1: i32) -> (i32, i32) {
    %c0_i32 = arith.constant 0 : i32
    %c0_i32_0 = arith.constant 0 : i32
    %c0_i32_1 = arith.constant 0 : i32
    return %c0_i32, %c0_i32_0 : i32, i32
  }
  func.func @transform_10(%arg0: i32, %arg1: i32) -> (i32, i32) {
    %c0_i32 = arith.constant 0 : i32
    %c0_i32_0 = arith.constant 0 : i32
    %c0_i32_1 = arith.constant 0 : i32
    return %c0_i32, %c0_i32_0 : i32, i32
  }
  func.func @transform_11(%arg0: i32, %arg1: i32) -> (i32, i32) {
    %c0_i32 = arith.constant 0 : i32
    %c0_i32_0 = arith.constant 0 : i32
    %c0_i32_1 = arith.constant 0 : i32
    return %c0_i32, %c0_i32_0 : i32, i32
  }
  func.func @transform_12(%arg0: i32, %arg1: i32) -> (i32, i32) {
    %c0_i32 = arith.constant 0 : i32
    %c0_i32_0 = arith.constant 0 : i32
    return %arg0, %c0_i32 : i32, i32
  }
}

</mosaic_0001>

<bundles_post_ra>
// kernel: tpu_custom_call.1
= control target key start
LH: loop header
LB: loop body
LE: loop exit
PB: predicated region body
PF: predicated region fallthrough
CT: control target
= control target key end

     0   :  { %s3221_s0 = inlined_call_operand.hbm [shape: f32[16,128], index: 0, kind: input, shape index: {}]   ;;  %s3222_s1 = inlined_call_operand.hbm [shape: f32[384,128], index: 1, kind: input, shape index: {}]   ;;  %s3223_s2 = inlined_call_operand.vmem [shape: s32[1,384], index: 2, kind: input, shape index: {}]   ;;  %s3224_s3 = inlined_call_operand.hbm [shape: s32[1,384], index: 3, kind: input, shape index: {}]   ;;  %s3225_s4 = inlined_call_operand.hbm [shape: f32[8,128], index: 4, kind: input, shape index: {}]   ;;  %s3226_s5 = inlined_call_operand.hbm [shape: f32[128,128], index: 5, kind: input, shape index: {}]   ;;  %s3227_s6 = inlined_call_operand.hbm [shape: f32[128,128], index: 6, kind: input, shape index: {}]   ;;  %s3228_s7 = inlined_call_operand.vmem [shape: f32[1,128], index: 7, kind: input, shape index: {}]   ;;  %s3229_s8 = inlined_call_operand.hbm [shape: f32[128,128], index: 8, kind: input, shape index: {}]   ;;  %s3230_s9 = inlined_call_operand.vmem [shape: f32[1,128], index: 9, kind: input, shape index: {}]   ;;  %s3231_s10 = inlined_call_operand.vmem [shape: f32[1,128], index: 10, kind: input, shape index: {}]   ;;  %s3232_s11 = inlined_call_operand.vmem [shape: f32[1,128], index: 11, kind: input, shape index: {}]   ;;  %s3233_s12 = inlined_call_operand.hbm [shape: f32[16,128], index: 12, kind: output, shape index: {}]  }
   0x1   :  { %3247 = sst [smem:[#allocation31_spill]] %s3221_s0 }
   0x2   :  { %3248 = sst [smem:[#allocation32_spill]] %s3222_s1 }
   0x3   :  { %3249 = sst [smem:[#allocation33_spill]] %s3223_s2 }
   0x4   :  { %3250 = sst [smem:[#allocation34_spill]] %s3225_s4 }
   0x5   :  { %3251 = sst [smem:[#allocation35_spill]] %s3226_s5 }
   0x6   :  { %3252 = sst [smem:[#allocation36_spill]] %s3227_s6 }
   0x7   :  { %3253 = sst [smem:[#allocation37_spill]] %s3228_s7 }
   0x8   :  { %3254 = sst [smem:[#allocation38_spill]] %s3229_s8 }
   0x9   :  { %3255 = sst [smem:[#allocation39_spill]] %s3230_s9 }
   0xa   :  { %3256 = sst [smem:[#allocation40_spill]] %s3231_s10 }
   0xb   :  { %3257 = sst [smem:[#allocation41_spill]] %s3232_s11 }
   0xc   :  { %3258 = sst [smem:[#allocation42_spill]] %s3233_s12 }
   0xd   :  { %17 = vsyncpa [#allocation7], 0 }
   0xe   :  { %19 = vsyncpa [#allocation7 + $0x1], 0 }
   0xf   :  { %20 = vsyncpa [#allocation10], 0 }
  0x10   :  { %22 = vsyncpa [#allocation10 + $0x1], 0 }
  0x11   :  { %23 = vsyncpa [#allocation13], 0 }
  0x12   :  { %24 = vsyncpa [#allocation16], 0 }
  0x13   :  { %25 = vsyncpa [#allocation8], 0 }
  0x14   :  { %27 = vsyncpa [#allocation8 + $0x1], 0  ;;  %s2708_s21 = smov 0   ;;  %s2710_s22 = smov 0  }
  0x15   :  { %s2712_s23 = smov 0   ;;  %s2714_s24 = smov 0  }
  0x16   :  { %s2716_s25 = smov 0   ;;  %s2718_s26 = smov 0  }
  0x17   :  { %s2720_s27 = smov 0   ;;  %s2722_s28 = smov 0  }
  0x18   :  { %s2724_s29 = smov 0   ;;  %s2726_s30 = smov 0  }
  0x19   :  { %s2728_s13 = smov 0  }
  0x1a LB: > { %3259 = sst [smem:[#allocation24_spill]] %s2601_s26  ;;  %s2764_s14 = sadd.s32 4294967295, %s2621_s13   ;;  %s2621_s13 = sphi %s2728_s13, %s33_s13   ;;  %s2617_s30 = sphi %s2726_s30, %s3309_s30   ;;  %s2613_s29 = sphi %s2724_s29, %s3316_s29   ;;  %s2609_s28 = sphi %s2722_s28, %s3307_s28   ;;  %s2605_s27 = sphi %s2720_s27, %s3315_s27   ;;  %s2601_s26 = sphi %s2718_s26, %s3306_s26   ;;  %s2597_s25 = sphi %s2716_s25, %s3314_s25   ;;  %s2593_s24 = sphi %s2714_s24, %s3313_s24   ;;  %s2589_s23 = sphi %s2712_s23, %s3312_s23   ;;  %s2585_s22 = sphi %s2710_s22, %s3311_s22   ;;  %s2581_s21 = sphi %s2708_s21, %s3310_s21  }
  0x1b   : > { %3260 = sst [smem:[#allocation25_spill]] %s2609_s28  ;;  %p1709_p0 = scmp.ge.s32.totalorder %s2621_s13, 1 }
  0x1c   : > { %3261 = sst [smem:[#allocation26_spill]] %s2617_s30  ;;  %p3235_p1 = scmp.eq.s32.totalorder %s2764_s14, 0 }
  0x1d   : > { %p348_p2 = scmp.lt.s32.totalorder %s2621_s13, 7  ;;  %s2623_s16 = smov [#allocation12]  }
  0x1e   : > { %s361_s17 = sshll.u32 %s2623_s16, 4  ;;  %s2624_s19 = smov [#allocation15]   ;;  %s362_s17 = int_to_ptr.vmem [resolvable:$true] %s361_s17 }
  0x1f   : > { %p2769_p3 = pnand %p1709_p0, %p348_p2  ;;  %s384_s20 = sshll.u32 %s2624_s19, 4  ;;  %s385_s20 = int_to_ptr.vmem [resolvable:$true] %s384_s20 }
  0x20   : > { %s2312_s12 = scalar_lea.vmem %s362_s17, 128  ;;  %p2320_p10 = scmp.lt.s32.totalorder %s362_s17, %s362_s17 }
  0x21   : > { %s3262_s15 = scalar_select %p2769_p3, 1, 0 }
  0x22   : > { %p2133_p4 = pneg %p2769_p3  ;;  %p2313_p7 = scmp.ne.s32.totalorder %s362_s17, %s2312_s12 }
  0x23   : > { %p2321_p11 = scmp.lt.s32.totalorder %s2312_s12, %s2312_s12 }
  0x24   : > { %p2777_p5 = pnand %p2133_p4, %p3235_p1 }
  0x25   : > { %p2322_p12 = por %p2321_p11, %p2320_p10 }
  0x26   : > { %p2303_p6 = pneg %p2777_p5 }
  0x28   : > { %p2315_p8 = pnand %p2313_p7, %p2303_p6 }
  0x2a   : > { %p2316_p9 = pneg %p2315_p8 }
  0x2c   : > { %p2323_p13 = pnand %p2322_p12, %p2316_p9 }
  0x2e   : > { %2326 = shalt.err (!%p2323_p13)
}
  0x2f   : > { %s3264_s4 = sld [smem:[#allocation34_spill]]  ;;  %s2338_s19 = scalar_lea.vmem %s385_s20, 2048 }
  0x30   : > { %p2339_p0 = scmp.ne.s32.totalorder %s385_s20, %s2338_s19  ;;  %p2346_p7 = scmp.lt.s32.totalorder %s385_s20, %s385_s20 }
  0x31   : > { %p2347_p8 = scmp.lt.s32.totalorder %s2338_s19, %s2338_s19 }
  0x32   : > { %p2341_p2 = pnand %p2339_p0, %p2303_p6 }
  0x33   : > { %p2348_p1 = por %p2347_p8, %p2346_p7 }
  0x34   : > { %p2342_p4 = pneg %p2341_p2 }
  0x35   : > { %2136 = dma.hbm_to_vmem [thread:$0]  (!%p2777_p5), %s3264_s4, 128, %s362_s17, [#allocation13]  }
  0x36   : > { %p2349_p3 = pnand %p2348_p1, %p2342_p4 }
  0x38   : > { %2352 = shalt.err (!%p2349_p3)
}
  0x39   : > { %s3237_s12 = smov 128   ;;  %s3239_s11 = smov 8  }
  0x3a   : > { %s3265_s6 = sld [smem:[#allocation36_spill]]  ;;  %p60_p1 = scmp.eq.s32.totalorder %s2621_s13, 0 }
  0x3b   : > { %p85_p3 = scmp.ne.s32.totalorder %s2589_s23, %s2585_s22  ;;  %p91_p9 = scmp.ne.s32.totalorder %s2585_s22, %s2581_s21 }
  0x3c   : > { %p2164_p10 = scmp.lt.s32.totalorder %s2621_s13, 6  ;;  %s441_s10 = sand.u32 1, %s2621_s13  }
  0x3d   : > { %p87_p11 = por %p85_p3, %p60_p1  ;;  %p3266_p12 = scmp.eq.s32.totalorder %s2764_s14, 0 }
  0x3e   : > { %s3241_s28 = sand.u32 1, %s2589_s23   ;;  %s1744_s7 = sshll.u32 %s2613_s29, 11 }
  0x3f   : > { %p2815_p13 = por %p91_p9, %p3266_p12  ;;  %s1717_s2 = sshll.u32 %s3241_s28, 7 }
  0x40   : > { %2142 = dma.hbm_to_vmem [thread:$0]  (!%p2777_p5), %s3265_s6, 2048, %s385_s20, [#allocation16], %s3237_s12, %s3237_s12, %s3239_s11  }
  0x41   : > { %s3268_s1 = sld [smem:[#allocation32_spill]]  ;;  %p2828_p0 = pnand %p2164_p10, %p87_p11 }
  0x42   : > { %s445_s4 = scalar_lea.vmem [#allocation9], %s1717_s2  ;;  %s2832_s12 = scalar_lea.sflag [#allocation10], %s441_s10 }
  0x43   : > { %s452_s19 = sshll.u32 %s445_s4, 4  ;;  %p3242_p2 = pneg %p2828_p0  ;;  %s453_s19 = int_to_ptr.vmem [resolvable:$true] %s452_s19 }
  0x44   : > { %s2366_s11 = scalar_lea.vmem %s453_s19, 2048 }
  0x45   : > { %p2367_p4 = scmp.ne.s32.totalorder %s453_s19, %s2366_s11 }
  0x47   : > { %s451_s16 = scalar_lea.hbm %s3268_s1, %s1744_s7  ;;  %p2369_p7 = pnand %p2367_p4, %p3242_p2 }
  0x48   : > { %s2627_s7 = smov [#allocation9]  }
  0x49   : > { %p2370_p8 = pneg %p2369_p7  ;;  %s2371_s17 = sshll.u32 %s2627_s7, 4  ;;  %s2372_s17 = int_to_ptr.vmem [resolvable:$false] %s2371_s17 }
  0x4a   : > { %s2373_s20 = scalar_lea.vmem %s2372_s17, 4096  ;;  %p2374_p3 = scmp.lt.s32.totalorder %s453_s19, %s2372_s17 }
  0x4b   : > { %p2375_p9 = scmp.lt.s32.totalorder %s2373_s20, %s2366_s11 }
  0x4d   : > { %p2376_p11 = por %p2375_p9, %p2374_p3 }
  0x4f   : > { %p2377_p12 = pnand %p2376_p11, %p2370_p8 }
  0x51   : > { %2380 = shalt.err (!%p2377_p12)
}
  0x52   : > { %s3270_s2 = smov 8   ;;  %s3271_s4 = smov 128  }
  0x53   : > { %2152 = dma.hbm_to_vmem [thread:$0]  (!%p2828_p0), %s451_s16, 2048, %s453_s19, %s2832_s12, %s3271_s4, %s3271_s4, %s3270_s2  }
  0x54   : > { %s2628_s10 = smov [#allocation14]   ;;  %s2629_s1 = smov [#allocation17]  }
  0x55   : > { %s371_s28 = sshll.u32 %s2628_s10, 4  ;;  %s400_s7 = sshll.u32 %s2629_s1, 4  ;;  %s372_s28 = int_to_ptr.vmem [resolvable:$true] %s371_s28  ;;  %s401_s7 = int_to_ptr.vmem [resolvable:$true] %s400_s7 }
  0x56   : > { %s2392_s6 = scalar_lea.vmem %s372_s28, 2048  ;;  %p2400_p3 = scmp.lt.s32.totalorder %s372_s28, %s372_s28 }
  0x57   : > { %p2393_p4 = scmp.ne.s32.totalorder %s372_s28, %s2392_s6  ;;  %p2401_p9 = scmp.lt.s32.totalorder %s2392_s6, %s2392_s6 }
  0x59   : > { %p2395_p7 = pnand %p2393_p4, %p2303_p6  ;;  %p2402_p11 = por %p2401_p9, %p2400_p3 }
  0x5b   : > { %p2396_p8 = pneg %p2395_p7 }
  0x5d   : > { %p2403_p12 = pnand %p2402_p11, %p2396_p8 }
  0x5f   : > { %2406 = shalt.err (!%p2403_p12)
}
  0x60   : > { %s3272_s5 = sld [smem:[#allocation35_spill]]  ;;  %s2418_s1 = scalar_lea.vmem %s401_s7, 2048 }
  0x61   : > { %p2419_p2 = scmp.ne.s32.totalorder %s401_s7, %s2418_s1  ;;  %p2426_p3 = scmp.lt.s32.totalorder %s401_s7, %s401_s7 }
  0x62   : > { %p2427_p8 = scmp.lt.s32.totalorder %s2418_s1, %s2418_s1 }
  0x63   : > { %p2421_p4 = pnand %p2419_p2, %p2303_p6 }
  0x64   : > { %p2428_p9 = por %p2427_p8, %p2426_p3 }
  0x65   : > { %p2422_p7 = pneg %p2421_p4 }
  0x66   : > { %2139 = dma.hbm_to_vmem [thread:$0]  (!%p2777_p5), %s3272_s5, 2048, %s372_s28, [#allocation13], %s3271_s4, %s3271_s4, %s3270_s2  }
  0x67   : > { %p2429_p11 = pnand %p2428_p9, %p2422_p7 }
  0x69   : > { %2432 = shalt.err (!%p2429_p11)
}
  0x6a   : > { %s3273_s8 = sld [smem:[#allocation38_spill]]  ;;  %s1708_s28 = sadd.s32 4294967294, %s2621_s13  }
  0x6b   : > { %s3274_s18 = sadd.s32 1, %s2613_s29  ;;  %s45_s17 = sadd.s32 1, %s2617_s30 }
  0x6c   : > { %p43_p6 = scmp.ge.s32.totalorder %s3274_s18, 3  ;;  %s52_s20 = sadd.s32 1, %s2601_s26 }
  0x6d   : > { %p59_p2 = scmp.ne.s32.totalorder %s2601_s26, %s2597_s25  ;;  %s3275_s10 = smov %s3274_s18 }
  0x6e   : > { %s3318_s10 = smov (%p43_p6, %s3275_s10), 0  ;;  %s3320_s17 = smov (!%p43_p6, %s45_s17), %s2617_s30 }
  0x6f   : > { %3276 = sst [smem:[#allocation27_spill]] %s3318_s10  ;;  %p65_p12 = scmp.ne.s32.totalorder %s2597_s25, %s2593_s24 }
  0x70   : > { %2145 = dma.hbm_to_vmem [thread:$0]  (!%p2777_p5), %s3273_s8, 2048, %s401_s7, [#allocation16], %s3271_s4, %s3271_s4, %s3270_s2  }
  0x71   : > { %p2884_p5 = por %p60_p1, %p59_p2  ;;  %p47_p4 = scmp.ge.s32.totalorder %s3320_s17, 2 }
  0x72   : > { %s75_s4 = ssub.s32 %s2613_s29, %s3318_s10  ;;  %p3278_p7 = scmp.eq.s32.totalorder %s2764_s14, 0 }
  0x73   : > { %p76_p8 = scmp.eq.s32.totalorder %s75_s4, 0  ;;  %s3322_s17 = smov (%p47_p4, %s3320_s17), 0 }
  0x74   : > { %p2897_p3 = por %p3278_p7, %p65_p12  ;;  %3280 = sst [smem:[#allocation28_spill]] %s3322_s17 }
  0x75   : > { %s3281_s11 = sadd.s32 1, %s2589_s23  ;;  %s49_s1 = ssub.s32 %s2617_s30, %s3322_s17 }
  0x76   : > { %s2906_s19 = scalar_select %p76_p8, %s2589_s23, %s3281_s11  }
  0x77   : > { %p335_p1 = scmp.eq.s32.totalorder %s2764_s14, 5  ;;  %p50_p9 = scmp.eq.s32.totalorder %s49_s1, 0 }
  0x78   : > { %3282 = sst [smem:[#allocation29_spill]] %s2906_s19  ;;  %p341_p11 = scmp.eq.s32.totalorder %s1708_s28, 5 }
  0x79   : > { %p2914_p6 = por %p335_p1, %p59_p2  ;;  %s423_s16 = sand.u32 1, %s2601_s26  }
  0x7a   : > { %s2920_s18 = scalar_select %p50_p9, %s2601_s26, %s52_s20  }
  0x7b   : > { %p2925_p4 = por %p341_p11, %p65_p12  ;;  %s1715_s11 = sshll.u32 %s423_s16, 3 }
  0x7c   : > { %3284 = sst [smem:[#allocation30_spill]] %s2920_s18  ;;  %s1716_s5 = sshll.u32 %s2617_s30, 7 }
  0x7d   : > { %s3286_s0 = sld [smem:[#allocation31_spill]]  ;;  %s427_s28 = scalar_lea.vmem [#allocation6], %s1715_s11 }
  0x7e   : > { %s434_s10 = sshll.u32 %s427_s28, 4  ;;  %p2937_p2 = pnand %p2164_p10, %p2884_p5  ;;  %s435_s10 = int_to_ptr.vmem [resolvable:$true] %s434_s10 }
  0x7f   : > { %s1720_s20 = sshll.u32 %s2613_s29, 4  ;;  %s424_s18 = scalar_lea.sflag [#allocation7], %s423_s16 }
  0x80   : > { %p2435_p12 = pneg %p2937_p2  ;;  %s2446_s26 = scalar_lea.vmem %s435_s10, 128 }
  0x81   : > { %p2447_p7 = scmp.ne.s32.totalorder %s435_s10, %s2446_s26  ;;  %s2630_s8 = smov [#allocation6]  }
  0x83   : > { %s432_s1 = scalar_lea.hbm %s3286_s0, %s1716_s5  ;;  %p2449_p8 = pnand %p2447_p7, %p2435_p12 }
  0x84   : > { %s2451_s5 = sshll.u32 %s2630_s8, 4  ;;  %s2452_s5 = int_to_ptr.vmem [resolvable:$false] %s2451_s5 }
  0x85   : > { %p2450_p1 = pneg %p2449_p8  ;;  %s2453_s17 = scalar_lea.vmem %s2452_s5, 256 }
  0x86   : > { %p2454_p9 = scmp.lt.s32.totalorder %s435_s10, %s2452_s5  ;;  %p2455_p11 = scmp.lt.s32.totalorder %s2453_s17, %s2446_s26 }
  0x88   : > { %p2456_p10 = por %p2455_p11, %p2454_p9 }
  0x8a   : > { %p2457_p5 = pnand %p2456_p10, %p2450_p1 }
  0x8c   : > { %2460 = shalt.err (!%p2457_p5)
}
  0x8d   : > { %2149 = dma.hbm_to_vmem [thread:$0]  (!%p2937_p2), %s432_s1, 128, %s435_s10, %s424_s18  }
  0x8e   : > { %s476_s11 = scalar_lea.hbm %s3224_s3, %s1720_s20  ;;  %s3288_s28 = sand.u32 1, %s2589_s23  }
  0x8f   : > { %s471_s0 = scalar_lea.vmem [#allocation11], %s3288_s28  ;;  %p3289_p7 = pneg %p2828_p0 }
  0x90   : > { %s478_s30 = sshll.u32 %s471_s0, 4  ;;  %s2631_s26 = smov [#allocation11]   ;;  %s479_s30 = int_to_ptr.vmem [resolvable:$true] %s478_s30 }
  0x91   : > { %s2474_s8 = scalar_lea.vmem %s479_s30, 16  ;;  %s2479_s5 = sshll.u32 %s2631_s26, 4  ;;  %s2480_s5 = int_to_ptr.vmem [resolvable:$false] %s2479_s5 }
  0x92   : > { %p2475_p12 = scmp.ne.s32.totalorder %s479_s30, %s2474_s8  ;;  %s2481_s19 = scalar_lea.vmem %s2480_s5, 32 }
  0x93   : > { %p2482_p9 = scmp.lt.s32.totalorder %s479_s30, %s2480_s5  ;;  %p2483_p2 = scmp.lt.s32.totalorder %s2481_s19, %s2474_s8 }
  0x94   : > { %p2477_p8 = pnand %p2475_p12, %p3289_p7 }
  0x95   : > { %p2484_p11 = por %p2483_p2, %p2482_p9 }
  0x96   : > { %p2478_p1 = pneg %p2477_p8 }
  0x98   : > { %p2485_p10 = pnand %p2484_p11, %p2478_p1 }
  0x9a   : > { %2488 = shalt.err (!%p2485_p10)
}
  0x9b   : > { %2155 = dma.hbm_to_vmem [thread:$0]  (!%p2828_p0), %s476_s11, 16, %s479_s30, %s2832_s12  }
  0x9c   : > { %p3290_p5 = scmp.ne.s32.totalorder %s3262_s15, 0 }
  0x9d   : > { %s2960_s0 = sand.u32 (!%p3290_p5), 1, %s2597_s25  }
  0x9e   : > { %487 = sbr.rel (%p3290_p5) target bundleno = 2140 (0x85c), region = 68  ;;  %s1722_s10 = sshll.u32 (!%p3290_p5), %s2960_s0, 3 }
  0x9f   : > { %s490_s18 = scalar_lea.sflag (!%p3290_p5), [#allocation7], %s2960_s0  ;;  %s2964_s1 = scalar_lea.vmem (!%p3290_p5), [#allocation6], %s1722_s10 }
  0xa3   : > { %2560 = dma.done.wait (%p2897_p3), %s490_s18, 128  }
  0xa4   : > { %2562 = vsyncadd (%p2897_p3), %s490_s18, 4294967168  ;;  %s498_s30 = sand.u32 1, %s2764_s14   ;;  %s500_s15 = sand.u32 1, %s2585_s22  }
  0xa5   : > { %s1723_s12 = sshll.u32 %s500_s15, 7  ;;  %s499_s21 = scalar_lea.sflag [#allocation10], %s498_s30 }
  0xa6   : > { %s2972_s20 = scalar_lea.vmem [#allocation9], %s1723_s12 }
  0xa7   : > { %2564 = dma.done.wait (%p2815_p13), %s499_s21, 2064  }
  0xa8   : > { %2566 = vsyncadd (%p2815_p13), %s499_s21, 4294965232  ;;  %s2978_s17 = scalar_lea.vmem [#allocation11], %s500_s15  ;;  %p3291_p0 = scmp.eq.s32.totalorder %s2764_s14, 0 }
  0xaa   : > { %2568 = dma.done.wait (%p3291_p0), [#allocation13], 2176   ;;  %p3292_p3 = pmov %p3291_p0 }
  0xab   : > { %p3293_p12 = pmov %p3291_p0 }
  0xac   : > { %2570 = vsyncadd (%p3292_p3), [#allocation13], 4294965120 }
  0xad   : > { %2572 = dma.done.wait (%p3293_p12), [#allocation16], 4096   ;;  %p3294_p7 = pmov %p3291_p0 }
  0xae   : > { %p580_p8 = scmp.lt.s32.totalorder %s2605_s27, 2  ;;  %s3295_s16 = sld [smem:[#allocation33_spill]] }
  0xaf   : > { %2574 = vsyncadd (%p3294_p7), [#allocation16], 4294963200  ;;  %s2996_s28 = scalar_lea.vmem [#allocation18], %s1722_s10  ;;  %p1729_p13 = scmp.ne.s32.totalorder %s2605_s27, 0 }
  0xb0   : > { %s2990_s7 = scalar_select %p580_p8, %s2605_s27, 2 }
  0xb1   : > { %586 = sbr.rel (%p1729_p13) target bundleno = 440 (0x1b8), region = 100  ;;  %s3296_s26 = sld [smem:[#allocation37_spill]] (!%p1729_p13) }
  0xb4   : > { %s582_s11 = scalar_lea.vmem %s3295_s16, %s2990_s7 }
  0xb6   : > { %v697_v0 = vld [vmem:[#allocation14 + $0x78] sm:$0xff]  ;;  %v2632_v2 = vmov 0.0   ;;  %v696_v3 = vld [vmem:[#allocation14 + $0x70] sm:$0xff]  ;;  %v695_v5 = vld [vmem:[#allocation14 + $0x68] sm:$0xff]  ;;  %vm2633_vm0 = vmmov 0   ;;  %vm882_vm1 = vcmask 7168   ;;  %v773_v38 = vlaneseq }
  0xb7   : > { %v603_v1 = vld [vmem:[#allocation15 + $0x78] sm:$0xff]  ;;  %1904 = vmatprep.subr.mxu1 %v2632_v2  ;;  %885 = vst [vmem:[#allocation5] sm:$0xff] %v2632_v2  ;;  %1869 = vmatprep.subr.mxu0 %v2632_v2  ;;  %v602_v4 = vld [vmem:[#allocation15 + $0x70] sm:$0xff]  ;;  %v601_v6 = vld [vmem:[#allocation15 + $0x68] sm:$0xff]  ;;  %v2634_v35 = vmov -1e+30  }
  0xb8   : > { %1905 = vmatpush3.msra.mxu1 %v697_v0  ;;  %1870 = vmatpush3.msra.mxu0 %v603_v1  ;;  %v694_v7 = vld [vmem:[#allocation14 + $0x60] sm:$0xff]  ;;  %v693_v9 = vld [vmem:[#allocation14 + $0x58] sm:$0xff]  ;;  %v692_v11 = vld [vmem:[#allocation14 + $0x50] sm:$0xff]  ;;  %883 = vst.msk [vmem:[#allocation3] sm:$0xff] %vm882_vm1, %v2634_v35  ;;  %v2635_v36 = vmov 1966171168  }
  0xb9   : > { %1906 = vmatprep.subr.mxu1 %v2632_v2  ;;  %1871 = vmatprep.subr.mxu0 %v2632_v2  ;;  %v600_v8 = vld [vmem:[#allocation15 + $0x60] sm:$0xff]  ;;  %v599_v10 = vld [vmem:[#allocation15 + $0x58] sm:$0xff]  ;;  %v598_v12 = vld [vmem:[#allocation15 + $0x50] sm:$0xff]  ;;  %884 = vst.msk [vmem:[#allocation4] sm:$0xff] %vm882_vm1, %v2632_v2  ;;  %v771_v37 = vunpack.c.l.s4 %v2635_v36  ;;  %v774_v40 = vshrl.u32 %v773_v38, 7 }
  0xba   : > { %1907 = vmatpush3.msra.mxu1 %v696_v3  ;;  %1872 = vmatpush3.msra.mxu0 %v602_v4  ;;  %v691_v13 = vld [vmem:[#allocation14 + $0x48] sm:$0xff]  ;;  %v690_v15 = vld [vmem:[#allocation14 + $0x40] sm:$0xff]  ;;  %v689_v17 = vld [vmem:[#allocation14 + $0x38] sm:$0xff] }
  0xbb   : > { %1908 = vmatprep.subr.mxu1 %v2632_v2  ;;  %1873 = vmatprep.subr.mxu0 %v2632_v2  ;;  %v597_v14 = vld [vmem:[#allocation15 + $0x48] sm:$0xff]  ;;  %v596_v16 = vld [vmem:[#allocation15 + $0x40] sm:$0xff]  ;;  %v595_v18 = vld [vmem:[#allocation15 + $0x38] sm:$0xff]  ;;  %v772_v39 = vunpack.c.0.s8 %v771_v37  ;;  %v820_v46 = vsub.s32 0, %v774_v40 }
  0xbc   : > { %1909 = vmatpush3.msra.mxu1 %v695_v5  ;;  %1874 = vmatpush3.msra.mxu0 %v601_v6  ;;  %v688_v19 = vld [vmem:[#allocation14 + $0x30] sm:$0xff]  ;;  %v687_v21 = vld [vmem:[#allocation14 + $0x28] sm:$0xff]  ;;  %v686_v23 = vld [vmem:[#allocation14 + $0x20] sm:$0xff] }
  0xbd   : > { %1910 = vmatprep.subr.mxu1 %v2632_v2  ;;  %1875 = vmatprep.subr.mxu0 %v2632_v2  ;;  %v594_v20 = vld [vmem:[#allocation15 + $0x30] sm:$0xff]  ;;  %v593_v22 = vld [vmem:[#allocation15 + $0x28] sm:$0xff]  ;;  %v592_v24 = vld [vmem:[#allocation15 + $0x20] sm:$0xff]  ;;  %v775_v41 = vsub.s32 %v772_v39, %v774_v40 }
  0xbe   : > { %1911 = vmatpush3.msra.mxu1 %v694_v7  ;;  %1876 = vmatpush3.msra.mxu0 %v600_v8  ;;  %v685_v25 = vld [vmem:[#allocation14 + $0x18] sm:$0xff]  ;;  %v684_v27 = vld [vmem:[#allocation14 + $0x10] sm:$0xff]  ;;  %v683_v29 = vld [vmem:[#allocation14 + $0x8] sm:$0xff] }
  0xbf   : > { %1912 = vmatprep.subr.mxu1 %v2632_v2  ;;  %1877 = vmatprep.subr.mxu0 %v2632_v2  ;;  %v591_v26 = vld [vmem:[#allocation15 + $0x18] sm:$0xff]  ;;  %v590_v28 = vld [vmem:[#allocation15 + $0x10] sm:$0xff]  ;;  %v589_v30 = vld [vmem:[#allocation15 + $0x8] sm:$0xff] }
  0xc0   : > { %1913 = vmatpush3.msra.mxu1 %v693_v9  ;;  %1878 = vmatpush3.msra.mxu0 %v599_v10  ;;  %v682_v31 = vld [vmem:[#allocation14] sm:$0xff]  ;;  %v587_v34 = vld [vmem:[#allocation12] sm:$0xff]  ;;  %v1730_v45 = vld [vmem:[%s3296_s26] ss:$0 sm:$0xff] }
  0xc1   : > { %1914 = vmatprep.subr.mxu1 %v2632_v2  ;;  %1879 = vmatprep.subr.mxu0 %v2632_v2  ;;  %v681_v32 = vld [vmem:[%s2964_s1] sm:$0xff] }
  0xc2   : > { %1915 = vmatpush3.msra.mxu1 %v692_v11  ;;  %1880 = vmatpush3.msra.mxu0 %v598_v12  ;;  %v588_v33 = vld [vmem:[#allocation15] sm:$0xff] }
  0xc3   : > { %1916 = vmatprep.subr.mxu1 %v2632_v2  ;;  %1881 = vmatprep.subr.mxu0 %v2632_v2 }
  0xc4   : > { %1917 = vmatpush3.msra.mxu1 %v691_v13  ;;  %1882 = vmatpush3.msra.mxu0 %v597_v14 }
  0xc5   : > { %1918 = vmatprep.subr.mxu1 %v2632_v2  ;;  %1883 = vmatprep.subr.mxu0 %v2632_v2 }
  0xc6   : > { %1919 = vmatpush3.msra.mxu1 %v690_v15  ;;  %1884 = vmatpush3.msra.mxu0 %v596_v16 }
  0xc7   : > { %1920 = vmatprep.subr.mxu1 %v2632_v2  ;;  %1885 = vmatprep.subr.mxu0 %v2632_v2 }
  0xc8   : > { %1921 = vmatpush3.msra.mxu1 %v689_v17  ;;  %1886 = vmatpush3.msra.mxu0 %v595_v18 }
  0xc9   : > { %1922 = vmatprep.subr.mxu1 %v2632_v2  ;;  %1887 = vmatprep.subr.mxu0 %v2632_v2 }
  0xca   : > { %1923 = vmatpush3.msra.mxu1 %v688_v19  ;;  %1888 = vmatpush3.msra.mxu0 %v594_v20 }
  0xcb   : > { %1924 = vmatprep.subr.mxu1 %v2632_v2  ;;  %1889 = vmatprep.subr.mxu0 %v2632_v2 }
  0xcc   : > { %1925 = vmatpush3.msra.mxu1 %v687_v21  ;;  %1890 = vmatpush3.msra.mxu0 %v593_v22 }
  0xcd   : > { %1926 = vmatprep.subr.mxu1 %v2632_v2  ;;  %1891 = vmatprep.subr.mxu0 %v2632_v2 }
  0xce   : > { %1927 = vmatpush3.msra.mxu1 %v686_v23  ;;  %1892 = vmatpush3.msra.mxu0 %v592_v24 }
  0xcf   : > { %1928 = vmatprep.subr.mxu1 %v2632_v2  ;;  %1893 = vmatprep.subr.mxu0 %v2632_v2 }
  0xd0   : > { %1929 = vmatpush3.msra.mxu1 %v685_v25  ;;  %1894 = vmatpush3.msra.mxu0 %v591_v26 }
  0xd1   : > { %1930 = vmatprep.subr.mxu1 %v2632_v2  ;;  %1895 = vmatprep.subr.mxu0 %v2632_v2 }
  0xd2   : > { %1931 = vmatpush3.msra.mxu1 %v684_v27  ;;  %1896 = vmatpush3.msra.mxu0 %v590_v28 }
  0xd3   : > { %1932 = vmatprep.subr.mxu1 %v2632_v2  ;;  %1936 = vmatprep.mubr.msk.f32.mxu1 %vm2633_vm0, %v2632_v2 }
  0xd4   : > { %1933 = vmatpush3.msra.mxu1 %v683_v29  ;;  %1897 = vmatprep.subr.mxu0 %v2632_v2 }
  0xd5   : > { %1934 = vmatprep.subr.mxu1 %v2632_v2  ;;  %1898 = vmatpush3.msra.mxu0 %v589_v30 }
  0xd6   : > { %1935 = vmatpush3.msra.mxu1 %v682_v31  ;;  %1899 = vmatprep.subr.mxu0 %v2632_v2 }
  0xd7   : > { %1937 = vmatmul.mubr.f32.vlgmr.msra.gmra.mxu1 %v681_v32  ;;  %1900 = vmatpush3.msra.mxu0 %v588_v33 }
  0xd8   : > { %1901 = vmatprep.mubr.msk.f32.mxu0 %vm2633_vm0, %v2632_v2 }
  0xd9   : > { %1902 = vmatmul.mubr.f32.vlgmr.msra.gmra.mxu0 %v587_v34 }
 0x197   : > { %v764_v42 = vpop.f32.mrf.mxu1 }
 0x198   : > { %v769_v43 = vcombine.high %v764_v42, %v764_v42  ;;  %v776_v44 = vrot.slane %v764_v42, %v775_v41 }
 0x199   : > { %v1938_v47 = vpop.f32.mrf.mxu1  ;;  %v677_v48 = vpop.f32.mrf.mxu0 }
 0x19a   : > { %v783_v49 = vrot.slane %v769_v43, %v775_v41  ;;  %v784_v50 = vcombine.high %v776_v44, %v776_v44  ;;  %v792_v51 = vrot.slane %v776_v44, %v775_v41  ;;  %v678_v52 = vadd.f32 %v1730_v45, %v677_v48 }
 0x19b   : > { %v1903_v53 = vpop.f32.mrf.mxu0 }
 0x19c   : > { %v785_v54 = vcombine.high %v783_v49, %v783_v49  ;;  %v799_v55 = vrot.slane %v783_v49, %v775_v41  ;;  %v806_v56 = vrot.slane %v784_v50, %v775_v41  ;;  %v814_v57 = vcombine.high %v792_v51, %v792_v51 }
 0x19d   : > { %v821_v58 = vrot.slane %v792_v51, %v820_v46 }
 0x19e   : > { %v813_v59 = vrot.slane %v785_v54, %v775_v41  ;;  %v815_v60 = vcombine.high %v799_v55, %v799_v55  ;;  %v816_v61 = vcombine.high %v806_v56, %v806_v56  ;;  %v825_v62 = vrot.slane %v806_v56, %v820_v46 }
 0x19f   : > { %v829_v63 = vrot.slane %v814_v57, %v820_v46  ;;  %v837_v0 = vrot.slane %v799_v55, %v820_v46  ;;  %v858_v1 = vadd.f32 %v821_v58, %v678_v52 }
 0x1a0   : > { %v817_v2 = vcombine.high %v813_v59, %v813_v59  ;;  %v833_v3 = vrot.slane %v816_v61, %v820_v46  ;;  %v841_v4 = vrot.slane %v813_v59, %v820_v46  ;;  %v845_v5 = vrot.slane %v815_v60, %v820_v46 }
 0x1a1   : > { %v859_v6 = vadd.f32 %v825_v62, %v678_v52  ;;  %v860_v7 = vadd.f32 %v829_v63, %v678_v52  ;;  %2274 = vtanh.f32 %v858_v1  ;;  %v862_v10 = vadd.f32 %v837_v0, %v678_v52 }
 0x1a2   : > { %v849_v8 = vrot.slane %v817_v2, %v820_v46  ;;  %v861_v9 = vadd.f32 %v833_v3, %v678_v52  ;;  %v863_v11 = vadd.f32 %v841_v4, %v678_v52  ;;  %v864_v12 = vadd.f32 %v845_v5, %v678_v52 }
 0x1a3   : > { %2276 = vtanh.f32 %v859_v6 }
 0x1a4   : > { %2278 = vtanh.f32 %v860_v7  ;;  %v865_v13 = vadd.f32 %v849_v8, %v678_v52 }
 0x1a5   : > { %2280 = vtanh.f32 %v861_v9 }
 0x1a6   : > { %2282 = vtanh.f32 %v862_v10 }
 0x1a7   : > { %2284 = vtanh.f32 %v863_v11 }
 0x1a8   : > { %2286 = vtanh.f32 %v864_v12 }
 0x1a9   : > { %2288 = vtanh.f32 %v865_v13 }
 0x1ae   : > { %v2275_v14 = vpop.eup %2274 }
 0x1af   : > { %874 = vst [vmem:[#allocation2 + $0x30] sm:$0xff] %v2275_v14 }
 0x1b0   : > { %v2277_v15 = vpop.eup %2276 }
 0x1b1   : > { %v2279_v16 = vpop.eup %2278  ;;  %875 = vst [vmem:[#allocation2] sm:$0xff] %v2277_v15 }
 0x1b2   : > { %v2281_v17 = vpop.eup %2280  ;;  %876 = vst [vmem:[#allocation2 + $0x18] sm:$0xff] %v2279_v16 }
 0x1b3   : > { %v2283_v18 = vpop.eup %2282  ;;  %877 = vst [vmem:[#allocation2 + $0x10] sm:$0xff] %v2281_v17 }
 0x1b4   : > { %v2285_v19 = vpop.eup %2284  ;;  %878 = vst [vmem:[#allocation2 + $0x8] sm:$0xff] %v2283_v18 }
 0x1b5   : > { %v2287_v20 = vpop.eup %2286  ;;  %879 = vst [vmem:[#allocation2 + $0x20] sm:$0xff] %v2285_v19 }
 0x1b6   : > { %v2289_v21 = vpop.eup %2288  ;;  %880 = vst [vmem:[#allocation2 + $0x28] sm:$0xff] %v2287_v20 }
 0x1b7   : > { %881 = vst [vmem:[#allocation2 + $0x38] sm:$0xff] %v2289_v21 }
 0x1b8 PF: > { %v917_v22 = vld [vmem:[#allocation14 + $0x78] sm:$0xff]  ;;  %v916_v23 = vld [vmem:[#allocation14 + $0x70] sm:$0xff]  ;;  %v915_v24 = vld [vmem:[#allocation14 + $0x68] sm:$0xff]  ;;  %v2636_v14 = vmov 0.0   ;;  %v1176_v15 = vlaneseq  ;;  %s3297_s5 = sld [smem:[#allocation25_spill]]  ;;  %vm1259_vm3 = vcmask 1041409  }
 0x1b9   : > { %1939 = vmatprep.subr.mxu0 %v917_v22  ;;  %v914_v25 = vld [vmem:[#allocation14 + $0x60] sm:$0xff]  ;;  %v3040_v26 = vld [vmem:[%s2972_s20] sm:$0xff]  ;;  %v911_v29 = vld [vmem:[#allocation14 + $0x48] sm:$0xff]  ;;  %vm1261_vm4 = vcmask 1042434   ;;  %vm1263_vm5 = vcmask 1043459   ;;  %vm1265_vm6 = vcmask 1044484  }
 0x1ba   : > { %1940 = vmatpush3.msra.mxu0 %v917_v22  ;;  %v913_v27 = vld [vmem:[#allocation14 + $0x58] sm:$0xff]  ;;  %1971 = vmatprep.mubr.f32.mxu0 %v3040_v26  ;;  %v912_v28 = vld [vmem:[#allocation14 + $0x50] sm:$0xff]  ;;  %v910_v30 = vld [vmem:[#allocation14 + $0x40] sm:$0xff]  ;;  %v3136_v16 = vshrl.u32 %v1176_v15, 7  ;;  %vm1267_vm7 = vcmask 1045509   ;;  %vm1269_vm8 = vcmask 1046534  }
 0x1bb   : > { %1941 = vmatprep.subr.mxu0 %v916_v23  ;;  %v909_v31 = vld [vmem:[#allocation14 + $0x38] sm:$0xff]  ;;  %v908_v32 = vld [vmem:[#allocation14 + $0x30] sm:$0xff]  ;;  %v907_v33 = vld [vmem:[#allocation14 + $0x28] sm:$0xff]  ;;  %vm1271_vm9 = vcmask 1047559   ;;  %vm1296_vm11 = vcmask 7168   ;;  %vm2638_vm12 = vmmov 0  }
 0x1bc   : > { %1942 = vmatpush3.msra.mxu0 %v916_v23  ;;  %v906_v34 = vld [vmem:[#allocation14 + $0x20] sm:$0xff]  ;;  %v905_v35 = vld [vmem:[#allocation14 + $0x18] sm:$0xff]  ;;  %v904_v36 = vld [vmem:[#allocation14 + $0x10] sm:$0xff]  ;;  %p1736_p1 = scmp.ne.s32.totalorder %s2605_s27, 2 }
 0x1bd   : > { %1943 = vmatprep.subr.mxu0 %v915_v24  ;;  %v903_v37 = vld [vmem:[#allocation14 + $0x8] sm:$0xff]  ;;  %v902_v38 = vld [vmem:[#allocation14] sm:$0xff]  ;;  %v3055_v42 = vld [vmem:[%s2972_s20 + $0x20] sm:$0xff]  ;;  %s3299_s15 = sld [smem:[#allocation39_spill]] (!%p1736_p1) }
 0x1be   : > { %1944 = vmatpush3.msra.mxu0 %v915_v24  ;;  %v3044_v39 = vld [vmem:[%s2972_s20 + $0x8] sm:$0xff]  ;;  %v3047_v40 = vld [vmem:[%s2972_s20 + $0x10] sm:$0xff]  ;;  %v3052_v41 = vld [vmem:[%s2972_s20 + $0x18] sm:$0xff]  ;;  %s1733_s19 = sshll.u32 %s3297_s5, 3  ;;  %s3301_s9 = sld [smem:[#allocation41_spill]] (!%p1736_p1) }
 0x1bf   : > { %1945 = vmatprep.subr.mxu0 %v914_v25  ;;  %v3060_v43 = vld [vmem:[%s2972_s20 + $0x28] sm:$0xff]  ;;  %v3063_v44 = vld [vmem:[%s2972_s20 + $0x30] sm:$0xff]  ;;  %v3068_v45 = vld [vmem:[%s2972_s20 + $0x38] sm:$0xff] }
 0x1c0   : > { %1946 = vmatpush3.msra.mxu0 %v914_v25  ;;  %v3071_v46 = vld [vmem:[%s2972_s20 + $0x40] sm:$0xff]  ;;  %v3076_v47 = vld [vmem:[%s2972_s20 + $0x48] sm:$0xff]  ;;  %v3079_v48 = vld [vmem:[%s2972_s20 + $0x50] sm:$0xff] }
 0x1c1   : > { %1947 = vmatprep.subr.mxu0 %v913_v27  ;;  %v3084_v49 = vld [vmem:[%s2972_s20 + $0x58] sm:$0xff]  ;;  %v3087_v50 = vld [vmem:[%s2972_s20 + $0x60] sm:$0xff]  ;;  %v3092_v51 = vld [vmem:[%s2972_s20 + $0x68] sm:$0xff] }
 0x1c2   : > { %1948 = vmatpush3.msra.mxu0 %v913_v27  ;;  %v3095_v52 = vld [vmem:[%s2972_s20 + $0x70] sm:$0xff]  ;;  %v3100_v53 = vld [vmem:[%s2972_s20 + $0x78] sm:$0xff]  ;;  %v1063_v54 = vld [vmem:[#allocation2 + $0x30] sm:$0xff]  ;;  %s3300_s20 = sld [smem:[#allocation40_spill]] (!%p1736_p1) }
 0x1c3   : > { %1949 = vmatprep.subr.mxu0 %v912_v28  ;;  %2027 = vmatprep.mubr.f32.mxu1 %v1063_v54  ;;  %v1064_v7 = vld [vmem:[#allocation2] sm:$0xff]  ;;  %v1065_v8 = vld [vmem:[#allocation2 + $0x18] sm:$0xff]  ;;  %v1066_v9 = vld [vmem:[#allocation2 + $0x10] sm:$0xff] }
 0x1c4   : > { %1950 = vmatpush3.msra.mxu0 %v912_v28  ;;  %v1067_v10 = vld [vmem:[#allocation2 + $0x8] sm:$0xff]  ;;  %v1068_v11 = vld [vmem:[#allocation2 + $0x20] sm:$0xff]  ;;  %v1070_v13 = vld [vmem:[#allocation2 + $0x38] sm:$0xff] }
 0x1c5   : > { %1951 = vmatprep.subr.mxu0 %v911_v29  ;;  %v1069_v12 = vld [vmem:[#allocation2 + $0x28] sm:$0xff]  ;;  %v1731_v17 = vld [vmem:[%s2978_s17] ss:$0 sm:$0xff] }
 0x1c6   : > { %1952 = vmatpush3.msra.mxu0 %v911_v29  ;;  %vm1183_vm2 = vcmp.eq.s32.totalorder %v1731_v17, %v3136_v16 }
 0x1c7   : > { %1953 = vmatprep.subr.mxu0 %v910_v30  ;;  %v1732_v18 = vsel %vm1183_vm2, 1.0, %v2636_v14 }
 0x1c8   : > { %1954 = vmatpush3.msra.mxu0 %v910_v30 }
 0x1c9   : > { %1955 = vmatprep.subr.mxu0 %v909_v31 }
 0x1ca   : > { %1956 = vmatpush3.msra.mxu0 %v909_v31 }
 0x1cb   : > { %1957 = vmatprep.subr.mxu0 %v908_v32 }
 0x1cc   : > { %1958 = vmatpush3.msra.mxu0 %v908_v32 }
 0x1cd   : > { %1959 = vmatprep.subr.mxu0 %v907_v33 }
 0x1ce   : > { %1960 = vmatpush3.msra.mxu0 %v907_v33 }
 0x1cf   : > { %1961 = vmatprep.subr.mxu0 %v906_v34 }
 0x1d0   : > { %1962 = vmatpush3.msra.mxu0 %v906_v34 }
 0x1d1   : > { %1963 = vmatprep.subr.mxu0 %v905_v35 }
 0x1d2   : > { %1964 = vmatpush3.msra.mxu0 %v905_v35 }
 0x1d3   : > { %1965 = vmatprep.subr.mxu0 %v904_v36 }
 0x1d4   : > { %1966 = vmatpush3.msra.mxu0 %v904_v36 }
 0x1d5   : > { %1967 = vmatprep.subr.mxu0 %v903_v37 }
 0x1d6   : > { %1968 = vmatpush3.msra.mxu0 %v903_v37 }
 0x1d7   : > { %1969 = vmatprep.subr.mxu0 %v902_v38 }
 0x1d8   : > { %1970 = vmatpush3.msra.mxu0 %v902_v38 }
 0x1d9   : > { %1972 = vmatmul.mubr.f32.vlgmr.msra.gmra.mxu0 %v3044_v39  ;;  %2039 = vmatprep.subr.mxu0 %v2636_v14 }
 0x1da   : > { %1974 = vmatprep.mubr.f32.mxu0 %v3047_v40  ;;  %2040 = vmatpush3.msra.mxu0 %v3100_v53 }
 0x1db   : > { %2041 = vmatprep.subr.mxu0 %v2636_v14 }
 0x1dc   : > { %2042 = vmatpush3.msra.mxu0 %v3095_v52 }
 0x1dd   : > { %1975 = vmatmul.mubr.f32.gmra.mxu0 %v3052_v41  ;;  %2043 = vmatprep.subr.mxu0 %v2636_v14 }
 0x1de   : > { %1977 = vmatprep.mubr.f32.mxu0 %v3055_v42  ;;  %2044 = vmatpush3.msra.mxu0 %v3092_v51 }
 0x1df   : > { %2045 = vmatprep.subr.mxu0 %v2636_v14 }
 0x1e0   : > { %2046 = vmatpush3.msra.mxu0 %v3087_v50 }
 0x1e1   : > { %1978 = vmatmul.mubr.f32.gmra.mxu0 %v3060_v43  ;;  %2047 = vmatprep.subr.mxu0 %v2636_v14 }
 0x1e2   : > { %1980 = vmatprep.mubr.f32.mxu0 %v3063_v44  ;;  %2048 = vmatpush3.msra.mxu0 %v3084_v49 }
 0x1e3   : > { %2049 = vmatprep.subr.mxu0 %v2636_v14 }
 0x1e4   : > { %2050 = vmatpush3.msra.mxu0 %v3079_v48 }
 0x1e5   : > { %1981 = vmatmul.mubr.f32.gmra.mxu0 %v3068_v45  ;;  %2051 = vmatprep.subr.mxu0 %v2636_v14 }
 0x1e6   : > { %1983 = vmatprep.mubr.f32.mxu0 %v3071_v46  ;;  %2052 = vmatpush3.msra.mxu0 %v3076_v47 }
 0x1e7   : > { %2053 = vmatprep.subr.mxu0 %v2636_v14 }
 0x1e8   : > { %2054 = vmatpush3.msra.mxu0 %v3071_v46 }
 0x1e9   : > { %1984 = vmatmul.mubr.f32.gmra.mxu0 %v3076_v47  ;;  %2055 = vmatprep.subr.mxu0 %v2636_v14 }
 0x1ea   : > { %1986 = vmatprep.mubr.f32.mxu0 %v3079_v48  ;;  %2056 = vmatpush3.msra.mxu0 %v3068_v45 }
 0x1eb   : > { %2057 = vmatprep.subr.mxu0 %v2636_v14 }
 0x1ec   : > { %2058 = vmatpush3.msra.mxu0 %v3063_v44 }
 0x1ed   : > { %1987 = vmatmul.mubr.f32.gmra.mxu0 %v3084_v49  ;;  %2059 = vmatprep.subr.mxu0 %v2636_v14 }
 0x1ee   : > { %1989 = vmatprep.mubr.f32.mxu0 %v3087_v50  ;;  %2060 = vmatpush3.msra.mxu0 %v3060_v43 }
 0x1ef   : > { %2061 = vmatprep.subr.mxu0 %v2636_v14 }
 0x1f0   : > { %2062 = vmatpush3.msra.mxu0 %v3055_v42 }
 0x1f1   : > { %1990 = vmatmul.mubr.f32.gmra.mxu0 %v3092_v51  ;;  %2063 = vmatprep.subr.mxu0 %v2636_v14 }
 0x1f2   : > { %1992 = vmatprep.mubr.f32.mxu0 %v3095_v52  ;;  %2064 = vmatpush3.msra.mxu0 %v3052_v41 }
 0x1f3   : > { %2065 = vmatprep.subr.mxu0 %v2636_v14 }
 0x1f4   : > { %2066 = vmatpush3.msra.mxu0 %v3047_v40 }
 0x1f5   : > { %1993 = vmatmul.mubr.f32.gmra.mxu0 %v3100_v53  ;;  %2067 = vmatprep.subr.mxu0 %v2636_v14 }
 0x1f6   : > { %2068 = vmatpush3.msra.mxu0 %v3044_v39  ;;  %2071 = vmatprep.mubr.msk.f32.mxu0 %vm2638_vm12, %v2636_v14 }
 0x1f7   : > { %2069 = vmatprep.subr.mxu0 %v2636_v14  ;;  %v1298_v14 = vld [vmem:[#allocation5] sm:$0xff] }
 0x1f8   : > { %2070 = vmatpush3.msra.mxu0 %v3040_v26 }
 0x299   : > { %v1973_v55 = vpop.f32.mrf.mxu0 }
 0x29b   : > { %v984_v56 = vpop.f32.mrf.mxu0 }
 0x29d   : > { %v1976_v57 = vpop.f32.mrf.mxu0 }
 0x29f   : > { %v994_v58 = vpop.f32.mrf.mxu0 }
 0x2a1   : > { %v1979_v59 = vpop.f32.mrf.mxu0 }
 0x2a3   : > { %v1004_v60 = vpop.f32.mrf.mxu0 }
 0x2a5   : > { %v1982_v61 = vpop.f32.mrf.mxu0 }
 0x2a7   : > { %v1014_v62 = vpop.f32.mrf.mxu0 }
 0x2a9   : > { %v1985_v63 = vpop.f32.mrf.mxu0 }
 0x2ab   : > { %v1024_v0 = vpop.f32.mrf.mxu0 }
 0x2ad   : > { %v1988_v1 = vpop.f32.mrf.mxu0 }
 0x2af   : > { %v1034_v2 = vpop.f32.mrf.mxu0 }
 0x2b1   : > { %v1991_v3 = vpop.f32.mrf.mxu0 }
 0x2b3   : > { %v1044_v4 = vpop.f32.mrf.mxu0 }
 0x2b5   : > { %v1994_v5 = vpop.f32.mrf.mxu0 }
 0x2b6   : > { %1995 = vmatprep.subr.mxu1 %v1994_v5 }
 0x2b7   : > { %v1054_v6 = vpop.f32.mrf.mxu0  ;;  %1996 = vmatpush3.xpose.msra.mxu1 %v1994_v5 }
 0x2b8   : > { %1997 = vmatprep.subr.mxu1 %v1054_v6 }
 0x2bb   : > { %1998 = vmatpush3.xpose.msra.mxu1 %v1054_v6 }
 0x2bc   : > { %1999 = vmatprep.subr.mxu1 %v1991_v3 }
 0x2bf   : > { %2000 = vmatpush3.xpose.msra.mxu1 %v1991_v3 }
 0x2c0   : > { %2001 = vmatprep.subr.mxu1 %v1044_v4 }
 0x2c3   : > { %2002 = vmatpush3.xpose.msra.mxu1 %v1044_v4 }
 0x2c4   : > { %2003 = vmatprep.subr.mxu1 %v1988_v1 }
 0x2c7   : > { %2004 = vmatpush3.xpose.msra.mxu1 %v1988_v1 }
 0x2c8   : > { %2005 = vmatprep.subr.mxu1 %v1034_v2 }
 0x2cb   : > { %2006 = vmatpush3.xpose.msra.mxu1 %v1034_v2 }
 0x2cc   : > { %2007 = vmatprep.subr.mxu1 %v1985_v63 }
 0x2cf   : > { %2008 = vmatpush3.xpose.msra.mxu1 %v1985_v63 }
 0x2d0   : > { %2009 = vmatprep.subr.mxu1 %v1024_v0 }
 0x2d3   : > { %2010 = vmatpush3.xpose.msra.mxu1 %v1024_v0 }
 0x2d4   : > { %2011 = vmatprep.subr.mxu1 %v1982_v61 }
 0x2d7   : > { %2012 = vmatpush3.xpose.msra.mxu1 %v1982_v61 }
 0x2d8   : > { %2013 = vmatprep.subr.mxu1 %v1014_v62 }
 0x2db   : > { %2014 = vmatpush3.xpose.msra.mxu1 %v1014_v62 }
 0x2dc   : > { %2015 = vmatprep.subr.mxu1 %v1979_v59 }
 0x2df   : > { %2016 = vmatpush3.xpose.msra.mxu1 %v1979_v59 }
 0x2e0   : > { %2017 = vmatprep.subr.mxu1 %v1004_v60 }
 0x2e3   : > { %2018 = vmatpush3.xpose.msra.mxu1 %v1004_v60 }
 0x2e4   : > { %2019 = vmatprep.subr.mxu1 %v1976_v57 }
 0x2e7   : > { %2020 = vmatpush3.xpose.msra.mxu1 %v1976_v57 }
 0x2e8   : > { %2021 = vmatprep.subr.mxu1 %v994_v58 }
 0x2eb   : > { %2022 = vmatpush3.xpose.msra.mxu1 %v994_v58 }
 0x2ec   : > { %2023 = vmatprep.subr.mxu1 %v1973_v55 }
 0x2ef   : > { %2024 = vmatpush3.xpose.msra.mxu1 %v1973_v55 }
 0x2f0   : > { %2025 = vmatprep.subr.mxu1 %v984_v56 }
 0x2f3   : > { %2026 = vmatpush3.xpose.msra.mxu1 %v984_v56 }
 0x2f6   : > { %2028 = vmatmul.mubr.f32.vlgmr.msra.gmra.mxu1 %v1064_v7 }
 0x2f7   : > { %2030 = vmatprep.mubr.f32.mxu1 %v1065_v8 }
 0x2fa   : > { %2031 = vmatmul.mubr.f32.gmra.mxu1 %v1066_v9  ;;  %v1243_v9 = vstv %s1733_s19 }
 0x2fb   : > { %2033 = vmatprep.mubr.f32.mxu1 %v1067_v10 }
 0x2fe   : > { %2034 = vmatmul.mubr.f32.gmra.mxu1 %v1068_v11 }
 0x2ff   : > { %2036 = vmatprep.mubr.f32.mxu1 %v1069_v12 }
 0x302   : > { %2037 = vmatmul.mubr.f32.gmra.mxu1 %v1070_v13 }
 0x3b6   : > { %v2029_v19 = vpop.f32.mrf.mxu1 }
 0x3b7   : > { %v1187_v20 = vmul.f32 %v2029_v19, %v1732_v18 }
 0x3b8   : > { %v1137_v21 = vpop.f32.mrf.mxu1 }
 0x3b9   : > { %v1200_v22 = vrot.slane %v1187_v20, 4  ;;  %v1186_v23 = vmul.f32 %v1732_v18, %v1137_v21  ;;  %v1244_v21 = vadd.s32 %v1243_v9, %v3136_v16 }
 0x3ba   : > { %v2032_v24 = vpop.f32.mrf.mxu1 }
 0x3bb   : > { %v1201_v25 = vadd.f32 %v1200_v22, %v1187_v20  ;;  %v1194_v27 = vrot.slane %v1186_v23, 4  ;;  %v1189_v28 = vmul.f32 %v2032_v24, %v1732_v18 }
 0x3bc   : > { %v1147_v29 = vpop.f32.mrf.mxu1 }
 0x3bd   : > { %v1202_v26 = vrot.slane %v1201_v25, 2  ;;  %v1195_v30 = vadd.f32 %v1194_v27, %v1186_v23  ;;  %v1212_v31 = vrot.slane %v1189_v28, 4  ;;  %v1188_v32 = vmul.f32 %v1732_v18, %v1147_v29  ;;  %v1734_v23 = vld [vmem:[%s582_s11] ss:$0 sm:$0xff] }
 0x3be   : > { %v2035_v33 = vpop.f32.mrf.mxu1  ;;  %vm1250_vm10 = vcmp.eq.s32.totalorder %v1734_v23, %v1244_v21 }
 0x3bf   : > { %v1196_v34 = vrot.slane %v1195_v30, 2  ;;  %v1213_v35 = vadd.f32 %v1212_v31, %v1189_v28  ;;  %v1206_v36 = vrot.slane %v1188_v32, 4  ;;  %v1191_v37 = vmul.f32 %v2035_v33, %v1732_v18  ;;  %v1275_v33 = vld [vmem:[#allocation3] sm:$0xff] }
 0x3c0   : > { %v1157_v38 = vpop.f32.mrf.mxu1  ;;  %v1203_v39 = vadd.f32 %v1202_v26, %v1201_v25 }
 0x3c1   : > { %v1197_v40 = vadd.f32 %v1196_v34, %v1195_v30  ;;  %v1214_v41 = vrot.slane %v1213_v35, 2  ;;  %v1207_v42 = vadd.f32 %v1206_v36, %v1188_v32  ;;  %v1224_v43 = vrot.slane %v1191_v37, 4 }
 0x3c2   : > { %v1190_v44 = vmul.f32 %v1732_v18, %v1157_v38  ;;  %v2038_v45 = vpop.f32.mrf.mxu1  ;;  %v1204_v52 = vrot.slane %v1203_v39, 1  ;;  %v2637_v32 = vmov 0  }
 0x3c3   : > { %v1198_v46 = vrot.slane %v1197_v40, 1  ;;  %v1208_v47 = vrot.slane %v1207_v42, 2  ;;  %v1225_v48 = vadd.f32 %v1224_v43, %v1191_v37  ;;  %v1193_v50 = vmul.f32 %v2038_v45, %v1732_v18  ;;  %2290 = vset.pattern.permute.xlu0 %v2637_v32  ;;  %2291 = vset.pattern.permute.xlu1 %v2637_v32 }
 0x3c4   : > { %v1218_v49 = vrot.slane %v1190_v44, 4  ;;  %v1167_v51 = vpop.f32.mrf.mxu1  ;;  %v1215_v53 = vadd.f32 %v1214_v41, %v1213_v35  ;;  %v1205_v1 = vadd.f32 %v1204_v52, %v1203_v39 }
 0x3c5   : > { %v1209_v54 = vadd.f32 %v1208_v47, %v1207_v42  ;;  %v1192_v55 = vmul.f32 %v1732_v18, %v1167_v51  ;;  %v1226_v56 = vrot.slane %v1225_v48, 2  ;;  %v1236_v58 = vrot.slane %v1193_v50, 4 }
 0x3c6   : > { %v1219_v57 = vadd.f32 %v1218_v49, %v1190_v44  ;;  %v1199_v59 = vadd.f32 %v1198_v46, %v1197_v40  ;;  %v1216_v2 = vrot.slane %v1215_v53, 1  ;;  %v1291_v44 = vld [vmem:[#allocation4] sm:$0xff] }
 0x3c7   : > { %v1210_v60 = vrot.slane %v1209_v54, 1  ;;  %v1230_v61 = vrot.slane %v1192_v55, 4  ;;  %v1227_v62 = vadd.f32 %v1226_v56, %v1225_v48  ;;  %v1237_v0 = vadd.f32 %v1236_v58, %v1193_v50 }
 0x3c8   : > { %v1220_v63 = vrot.slane %v1219_v57, 2  ;;  %v1260_v7 = vsel %vm1259_vm3, %v1205_v1, %v1199_v59  ;;  %v1217_v17 = vadd.f32 %v1216_v2, %v1215_v53 }
 0x3c9   : > { %v1211_v3 = vadd.f32 %v1210_v60, %v1209_v54  ;;  %v1231_v4 = vadd.f32 %v1230_v61, %v1192_v55  ;;  %v1238_v6 = vrot.slane %v1237_v0, 2  ;;  %v1228_v11 = vrot.slane %v1227_v62, 1 }
 0x3ca   : > { %v1221_v5 = vadd.f32 %v1220_v63, %v1219_v57 }
 0x3cb   : > { %v1232_v8 = vrot.slane %v1231_v4, 2  ;;  %v1262_v10 = vsel %vm1261_vm4, %v1211_v3, %v1260_v7  ;;  %v1239_v13 = vadd.f32 %v1238_v6, %v1237_v0  ;;  %v1229_v25 = vadd.f32 %v1228_v11, %v1227_v62 }
 0x3cc   : > { %v1222_v12 = vrot.slane %v1221_v5, 1  ;;  %v1264_v24 = vsel %vm1263_vm5, %v1217_v17, %v1262_v10 }
 0x3cd   : > { %v1233_v18 = vadd.f32 %v1232_v8, %v1231_v4  ;;  %v1240_v20 = vrot.slane %v1239_v13, 1 }
 0x3ce   : > { %v1223_v19 = vadd.f32 %v1222_v12, %v1221_v5 }
 0x3cf   : > { %v1234_v22 = vrot.slane %v1233_v18, 1  ;;  %v1241_v29 = vadd.f32 %v1240_v20, %v1239_v13 }
 0x3d0   : > { %v1266_v27 = vsel %vm1265_vm6, %v1223_v19, %v1264_v24 }
 0x3d1   : > { %v1235_v28 = vadd.f32 %v1234_v22, %v1233_v18  ;;  %v1268_v26 = vsel %vm1267_vm7, %v1229_v25, %v1266_v27 }
 0x3d3   : > { %v1270_v30 = vsel %vm1269_vm8, %v1235_v28, %v1268_v26 }
 0x3d4   : > { %v1272_v31 = vsel %vm1271_vm9, %v1241_v29, %v1270_v30 }
 0x3d5   : > { %v1274_v16 = vsel %vm1250_vm10, %v1272_v31, -1e+30 }
 0x3d6   : > { %1276 = vmax.xlane.f32.xlu0 %v1274_v16 }
 0x45f   : > { %v1277_v34 = vpop.xlane.xlu0 %1276 }
 0x460   : > { %v1278_v35 = vmax.f32 %v1275_v33, %v1277_v34 }
 0x462   : > { %v1279_v36 = vsub.f32 %v1275_v33, %v1278_v35  ;;  %1377 = vst.msk [vmem:[#allocation3] sm:$0xff] %vm1296_vm11, %v1278_v35  ;;  %1284 = vperm.xlu0 %2290, %v1278_v35  }
 0x464   : > { %v1280_v41 = vmul.f32 1.442695, %v1279_v36 }
 0x4dd   : > { %v1285_v37 = vpop.permute.xlu0 %1284 }
 0x4de   : > { %v1287_v38 = vsub.f32 %v1274_v16, %v1285_v37 }
 0x4e0   : > { %v1288_v39 = vmul.f32 1.442695, %v1287_v38 }
 0x4e2   : > { %2292 = vpow2.f32 %v1288_v39 }
 0x4e3   : > { %2294 = vpow2.f32 %v1280_v41 }
 0x4ef   : > { %v2293_v40 = vpop.eup %2292 }
 0x4f0   : > { %2072 = vmatmul.mubr.msk.f32.vlgmr.msra.gmra.mxu0 %vm1250_vm10, %v2293_v40  ;;  %v1290_v42 = vsel %vm1250_vm10, %v2293_v40, 0.0  ;;  %v2295_v43 = vpop.eup %2294 }
 0x4f1   : > { %1293 = vadd.xlane.f32.xlu1 %v1290_v42  ;;  %v1292_v45 = vmul.f32 %v2295_v43, %v1291_v44 }
 0x502   : > { %1301 = vperm.xlu1 %2291, %v2295_v43  }
 0x57a   : > { %v1294_v46 = vpop.xlane.xlu1 %1293 }
 0x57b   : > { %v1295_v47 = vadd.f32 %v1294_v46, %v1292_v45 }
 0x57d   : > { %1297 = vst.msk [vmem:[#allocation4] sm:$0xff] %vm1296_vm11, %v1295_v47 }
 0x57e   : > { %v1302_v48 = vpop.permute.xlu1 %1301 }
 0x57f   : > { %v1304_v49 = vmul.f32 %v1302_v48, %v1298_v14 }
 0x5af   : > { %1381 = sbr.rel (%p1736_p1) target bundleno = 2116 (0x844), region = 104 }
 0x5b0   : > { %v1371_v50 = vpop.f32.mrf.mxu0 }
 0x5b1   : > { %v1375_v51 = vadd.f32 %v1371_v50, %v1304_v49 }
 0x5b2   : > { %v2073_v52 = vpop.f32.mrf.mxu0 }
 0x5b3   : > { %1376 = vst [vmem:[#allocation5] sm:$0xff] %v1375_v51 }
 0x5b4   : > { %v1382_v53 = vld [vmem:[#allocation4] sm:$0xff]  ;;  %v2639_v55 = vmov 0   ;;  %v2640_v57 = vmov 0.0   ;;  %v1408_v59 = vld [vmem:[#allocation17 + $0x68] sm:$0xff]  ;;  %v1407_v60 = vld [vmem:[#allocation17 + $0x60] sm:$0xff]  ;;  %vm2641_vm13 = vmmov 0  }
 0x5b5   : > { %v1410_v54 = vld [vmem:[#allocation17 + $0x78] sm:$0xff]  ;;  %2296 = vset.pattern.permute.xlu0 %v2639_v55  ;;  %v1383_v56 = vmax.f32 %v1382_v53, 1e-06  ;;  %2074 = vmatprep.subr.mxu0 %v2640_v57  ;;  %v1409_v58 = vld [vmem:[#allocation17 + $0x70] sm:$0xff]  ;;  %v1404_v63 = vld [vmem:[#allocation17 + $0x48] sm:$0xff]  ;;  %v1492_v20 = vand.u32 127, %v1176_v15 }
 0x5b6   : > { %2075 = vmatpush3.msra.mxu0 %v1410_v54  ;;  %v1406_v61 = vld [vmem:[#allocation17 + $0x58] sm:$0xff]  ;;  %v1405_v62 = vld [vmem:[#allocation17 + $0x50] sm:$0xff]  ;;  %v1403_v0 = vld [vmem:[#allocation17 + $0x40] sm:$0xff]  ;;  %2106 = vmatprep.mubr.msk.f32.mxu0 %vm2641_vm13, %v2640_v57 }
 0x5b7   : > { %2297 = vrcp.f32 %v1383_v56  ;;  %2076 = vmatprep.subr.mxu0 %v2640_v57  ;;  %v1402_v1 = vld [vmem:[#allocation17 + $0x38] sm:$0xff]  ;;  %v1401_v4 = vld [vmem:[#allocation17 + $0x30] sm:$0xff]  ;;  %v1400_v6 = vld [vmem:[#allocation17 + $0x28] sm:$0xff]  ;;  %vm1493_vm15 = vcmp.lt.s32.totalorder %v1492_v20, 40 }
 0x5b8   : > { %2077 = vmatpush3.msra.mxu0 %v1409_v58  ;;  %v1399_v8 = vld [vmem:[#allocation17 + $0x20] sm:$0xff]  ;;  %v1398_v9 = vld [vmem:[#allocation17 + $0x18] sm:$0xff]  ;;  %v1397_v10 = vld [vmem:[#allocation17 + $0x10] sm:$0xff] }
 0x5b9   : > { %2078 = vmatprep.subr.mxu0 %v2640_v57  ;;  %v1396_v11 = vld [vmem:[#allocation17 + $0x8] sm:$0xff]  ;;  %v1395_v12 = vld [vmem:[#allocation17] sm:$0xff] }
 0x5ba   : > { %2079 = vmatpush3.msra.mxu0 %v1408_v59  ;;  %v1388_v13 = vld [vmem:[#allocation5] sm:$0xff]  ;;  %v1737_v19 = vld [vmem:[%s3299_s15] ss:$0 sm:$0xff] }
 0x5bb   : > { %2080 = vmatprep.subr.mxu0 %v2640_v57  ;;  %v1738_v34 = vld [vmem:[%s3300_s20] ss:$0 sm:$0xff] }
 0x5bc   : > { %2081 = vmatpush3.msra.mxu0 %v1407_v60  ;;  %v1739_v36 = vld [vmem:[%s3301_s9] ss:$0 sm:$0xff] }
 0x5bd   : > { %2082 = vmatprep.subr.mxu0 %v2640_v57 }
 0x5be   : > { %2083 = vmatpush3.msra.mxu0 %v1406_v61 }
 0x5bf   : > { %2084 = vmatprep.subr.mxu0 %v2640_v57 }
 0x5c0   : > { %2085 = vmatpush3.msra.mxu0 %v1405_v62 }
 0x5c1   : > { %2086 = vmatprep.subr.mxu0 %v2640_v57 }
 0x5c2   : > { %2087 = vmatpush3.msra.mxu0 %v1404_v63 }
 0x5c3   : > { %2088 = vmatprep.subr.mxu0 %v2640_v57 }
 0x5c4   : > { %v2298_v2 = vpop.eup %2297  ;;  %2089 = vmatpush3.msra.mxu0 %v1403_v0 }
 0x5c5   : > { %v1385_v3 = vmul.f32 %v2298_v2, %v1383_v56  ;;  %2090 = vmatprep.subr.mxu0 %v2640_v57 }
 0x5c6   : > { %2091 = vmatpush3.msra.mxu0 %v1402_v1 }
 0x5c7   : > { %v1386_v5 = vsub.f32 2.0, %v1385_v3  ;;  %2092 = vmatprep.subr.mxu0 %v2640_v57 }
 0x5c8   : > { %2093 = vmatpush3.msra.mxu0 %v1401_v4 }
 0x5c9   : > { %v1387_v7 = vmul.f32 %v2298_v2, %v1386_v5  ;;  %2094 = vmatprep.subr.mxu0 %v2640_v57 }
 0x5ca   : > { %2095 = vmatpush3.msra.mxu0 %v1400_v6 }
 0x5cb   : > { %1391 = vperm.xlu0 %2296, %v1387_v7   ;;  %2096 = vmatprep.subr.mxu0 %v2640_v57 }
 0x5cc   : > { %2097 = vmatpush3.msra.mxu0 %v1399_v8 }
 0x5cd   : > { %2098 = vmatprep.subr.mxu0 %v2640_v57 }
 0x5ce   : > { %2099 = vmatpush3.msra.mxu0 %v1398_v9 }
 0x5cf   : > { %2100 = vmatprep.subr.mxu0 %v2640_v57 }
 0x5d0   : > { %2101 = vmatpush3.msra.mxu0 %v1397_v10 }
 0x5d1   : > { %2102 = vmatprep.subr.mxu0 %v2640_v57 }
 0x5d2   : > { %2103 = vmatpush3.msra.mxu0 %v1396_v11 }
 0x5d3   : > { %2104 = vmatprep.subr.mxu0 %v2640_v57 }
 0x5d4   : > { %2105 = vmatpush3.msra.mxu0 %v1395_v12 }
 0x646   : > { %v1392_v17 = vpop.permute.xlu0 %1391 }
 0x647   : > { %v1394_v18 = vmul.f32 %v1392_v17, %v1388_v13 }
 0x649   : > { %2107 = vmatmul.mubr.f32.vlgmr.msra.gmra.mxu0 %v1394_v18 }
 0x709   : > { %v1484_v21 = vpop.f32.mrf.mxu0 }
 0x70a   : > { %v1485_v22 = vadd.f32 %v1737_v19, %v1484_v21 }
 0x70b   : > { %v2108_v23 = vpop.f32.mrf.mxu0 }
 0x70c   : > { %v1489_v24 = vmul.f32 0.01, %v1485_v22  ;;  %vm1488_vm14 = vcmp.ge.f32.partialorder %v1485_v22, 0.0 }
 0x70e   : > { %v1490_v25 = vsel %vm1488_vm14, %v1485_v22, %v1489_v24 }
 0x70f   : > { %v1494_v27 = vsel %vm1493_vm15, %v1490_v25, 0.0 }
 0x710   : > { %1495 = vadd.xlane.f32.xlu0 %v1494_v27 }
 0x799   : > { %v1496_v28 = vpop.xlane.xlu0 %1495 }
 0x79a   : > { %v1498_v29 = vmul.f32 0.025, %v1496_v28 }
 0x79c   : > { %v1499_v26 = vsub.f32 %v1490_v25, %v1498_v29 }
 0x79e   : > { %v1500_v30 = vmul.f32 %v1499_v26, %v1499_v26 }
 0x7a0   : > { %v1501_v31 = vsel %vm1493_vm15, %v1500_v30, 0.0 }
 0x7a1   : > { %1502 = vadd.xlane.f32.xlu1 %v1501_v31 }
 0x82a   : > { %v1503_v16 = vpop.xlane.xlu1 %1502 }
 0x82b   : > { %v1504_v32 = vmul.f32 0.025, %v1503_v16 }
 0x82d   : > { %v1505_v33 = vadd.f32 1e-05, %v1504_v32 }
 0x82f   : > { %2299 = vrsqrt.f32 %v1505_v33 }
 0x83c   : > { %v2300_v15 = vpop.eup %2299 }
 0x83d   : > { %v1507_v35 = vmul.f32 %v2300_v15, %v1499_v26 }
 0x83f   : > { %v1515_v37 = vmul.f32 %v1738_v34, %v1507_v35 }
 0x841   : > { %v1523_v38 = vadd.f32 %v1739_v36, %v1515_v37 }
 0x843   : > { %1524 = vst [vmem:[%s2996_s28] sm:$0xff] %v1523_v38 }
 0x844 PF: > { %s3302_s2 = sld [smem:[#allocation25_spill]]  ;;  %s1539_s5 = sshll.u32 %s2996_s28, 4  ;;  %s1540_s5 = int_to_ptr.vmem [resolvable:$true] %s1539_s5 }
 0x845   : > { %s3303_s8 = sld [smem:[#allocation42_spill]]  ;;  %s1526_s19 = scalar_lea.sflag [#allocation8], %s2960_s0 }
 0x846   : > { %s2489_s10 = scalar_lea.vmem %s1540_s5, 128  ;;  %s2642_s18 = smov [#allocation18]  }
 0x847   : > { %p2490_p9 = scmp.ne.s32.totalorder %s1540_s5, %s2489_s10  ;;  %s2493_s1 = sshll.u32 %s2642_s18, 4  ;;  %s2494_s1 = int_to_ptr.vmem [resolvable:$false] %s2493_s1 }
 0x848   : > { %s2495_s27 = scalar_lea.vmem %s2494_s1, 256  ;;  %p2496_p10 = scmp.lt.s32.totalorder %s1540_s5, %s2494_s1 }
 0x849   : > { %p2491_p2 = pnand %p2490_p9, %p2914_p6  ;;  %p2497_p5 = scmp.lt.s32.totalorder %s2495_s27, %s2489_s10 }
 0x84a   : > { %s1741_s16 = sshll.u32 %s3302_s2, 7 }
 0x84b   : > { %s1537_s26 = scalar_lea.hbm %s3303_s8, %s1741_s16  ;;  %p2492_p11 = pneg %p2491_p2 }
 0x84c   : > { %p2498_p0 = por %p2497_p5, %p2496_p10 }
 0x84e   : > { %p2499_p3 = pnand %p2498_p0, %p2492_p11 }
 0x850   : > { %2502 = shalt.err (!%p2499_p3)
}
 0x851   : > { %s2503_s30 = scalar_lea.hbm %s1537_s26, 128  ;;  %s2507_s15 = scalar_lea.hbm %s3303_s8, 256 }
 0x852   : > { %p2504_p12 = scmp.ne.s32.totalorder %s1537_s26, %s2503_s30  ;;  %p2508_p13 = scmp.lt.s32.totalorder %s1537_s26, %s3303_s8 }
 0x853   : > { %p2509_p1 = scmp.lt.s32.totalorder %s2507_s15, %s2503_s30 }
 0x854   : > { %p2505_p7 = pnand %p2504_p12, %p2914_p6 }
 0x855   : > { %p2510_p9 = por %p2509_p1, %p2508_p13 }
 0x856   : > { %p2506_p8 = pneg %p2505_p7 }
 0x858   : > { %p2511_p2 = pnand %p2510_p9, %p2506_p8 }
 0x85a   : > { %2514 = shalt.err (!%p2511_p2)
}
 0x85b   : > { %2131 = dma.vmem_to_hbm [thread:$0]  (%p2914_p6), %s1540_s5, 128, %s1537_s26, %s1526_s19  }
 0x85c PF: > { %p2169_p11 = scmp.ge.s32.totalorder %s2621_s13, 2  ;;  %s1551_s20 = sand.u32 1, %s2593_s24  }
 0x85d   : > { %s1552_s17 = scalar_lea.sflag [#allocation8], %s1551_s20 }
 0x85e   : > { %p2157_p10 = pnand %p2169_p11, %p2925_p4 }
 0x860   : > { %p2158_p5 = pneg %p2157_p10 }
 0x862   : > { %2576 = dma.done.wait (%p2158_p5), %s1552_s17, 128  }
 0x863   : > { %2578 = vsyncadd (%p2158_p5), %s1552_s17, 4294967168  ;;  %s33_s13 = sadd.s32 1, %s2621_s13   ;;  %s3304_s7 = sld [smem:[#allocation29_spill]] }
 0x864   : > { %p30_p0 = scmp.ge.s32.totalorder %s33_s13, 8   ;;  %s3305_s6 = sld [smem:[#allocation24_spill]] }
 0x865   : > { %s3306_s26 = sld [smem:[#allocation30_spill]]  ;;  %s3310_s21 = smov %s2585_s22 }
 0x866   : > { %s3307_s28 = sld [smem:[#allocation26_spill]]  ;;  %s3311_s22 = smov %s2589_s23 }
 0x867   : > { %s3308_s9 = sld [smem:[#allocation27_spill]]  ;;  %s3313_s24 = smov %s2597_s25 }
 0x868   : > { %s3309_s30 = sld [smem:[#allocation28_spill]]  ;;  %s3315_s27 = smov %s2613_s29 }
 0x869   : > { %s3312_s23 = smov %s3304_s7  ;;  %32 = sbr.rel (!%p30_p0) target bundleno = 26 (0x1a), region = 164 }
 0x86a   : > { %s3314_s25 = smov %s3305_s6 }
 0x86d   : > { %s3316_s29 = smov %s3308_s9 }
 0x86e   :  { %1557 = vsyncpa [#allocation7], 1 }
 0x86f   :  { %1559 = vsyncpa [#allocation7 + $0x1], 1 }
 0x870   :  { %1560 = vsyncpa [#allocation10], 1 }
 0x871   :  { %1562 = vsyncpa [#allocation10 + $0x1], 1 }
 0x872   :  { %1563 = vsyncpa [#allocation13], 1 }
 0x873   :  { %1564 = vsyncpa [#allocation16], 1 }
 0x874   :  { %1565 = vsyncpa [#allocation8], 1 }
 0x875   :  { %1567 = vsyncpa [#allocation8 + $0x1], 1 }

</bundles_post_ra>
